<compile_context>
chip_gen: v6e
topology: v6e:2x2x1
jax: 0.10.0
libtpu: 0.0.40
codegen_flags: <defaults>
</compile_context>

<pallas_src>
import jax
import jax.numpy as jnp
from jax.experimental import pallas as pl
from jax.experimental.pallas import tpu as pltpu


def encoder_kernel(x_ref, w1_ref, w2_ref, o_ref):
    # x_ref:  (L, TB)          input block, batch on lanes (TB = multiple of 128)
    # w1_ref: (C1, 8)          [conv1 taps k=0..2 | b1 | 0 0 0 0]      (C1 = 64)
    # w2_ref: (C2, 3*C1 + 8)   [W2^T / L, tap-major | b2 | 0 x7]       (C2 = 128)
    # o_ref:  (C2, TB)         pooled features for this batch block
    L, TB = x_ref.shape
    C1 = w1_ref.shape[0]

    w1a = w1_ref[...]                                        # (C1, 8), tiny
    ones_row = jnp.ones((1, TB), jnp.float32)
    # Hoisted constant tails (ones row selects the bias column, zeros pad K
    # to a multiple of 8). Built once per grid step, reused in the loop.
    tap_tail = jnp.concatenate(
        [ones_row, jnp.zeros((4, TB), jnp.float32)], axis=0)   # (5, TB)
    col_tail = jnp.concatenate(
        [ones_row, jnp.zeros((7, TB), jnp.float32)], axis=0)   # (8, TB)

    def h1_col(l):
        # Post-ReLU conv1 output at position l:
        #   relu(W1 @ [x[l-1], x[l], x[l+1], 1, 0, 0, 0, 0])  -> (C1, TB)
        lo = jnp.where(l > 0, 1.0, 0.0)            # zero "same" padding at l=0
        hi = jnp.where(l < L - 1, 1.0, 0.0)        # and at l=L-1
        xm = x_ref[pl.ds(jnp.maximum(l - 1, 0), 1), :] * lo
        x0 = x_ref[pl.ds(l, 1), :]
        xp = x_ref[pl.ds(jnp.minimum(l + 1, L - 1), 1), :] * hi
        taps = jnp.concatenate([xm, x0, xp, tap_tail], axis=0)        # (8, TB)
        h = jnp.dot(w1a, taps, preferred_element_type=jnp.float32)    # (C1, TB)
        return jnp.maximum(h, 0.0)

    # Fused conv1 + ReLU + sum over L (review item 1: the (TB, L, 64) blob is
    # never built; the loop carries only a (C1, TB) accumulator).
    s = jax.lax.fori_loop(
        0, L, lambda l, acc: acc + h1_col(l),
        jnp.zeros((C1, TB), jnp.float32),
        unroll=True if L <= 32 else 1)

    # Boundary columns of the post-ReLU feature map, needed to correct the
    # zero-padded conv2 taps after hoisting the mean (two tiny extra matmuls).
    first = h1_col(0)                                        # h1[:, 0]
    last = h1_col(L - 1)                                     # h1[:, L-1]

    # AdaptiveAvgPool1d(1) hoisted through conv2: a single MXU matmul.
    # 1/L and b2 are already folded into w2_ref; the trailing ones/zero rows
    # line up with the bias / zero-pad columns of w2_ref.
    cols = jnp.concatenate([s - last, s, s - first, col_tail], axis=0)
    y = jnp.dot(w2_ref[...], cols, preferred_element_type=jnp.float32)
    o_ref[...] = y.astype(o_ref.dtype)                       # (C2, TB) lane-dense


def encoder_forward(x_ncl, w1, b1, w2, b2, tb=512):
    """x_ncl: (B, 1, L) like PyTorch NCL.  Returns (B, 128)."""
    B, Cin, L = x_ncl.shape
    assert Cin == 1
    C1, _, K1 = w1.shape
    C2, C1b, K2 = w2.shape
    assert K1 == 3 and K2 == 3 and C1b == C1     # padding=1 / kernel=3 algebra

    def rup(a, m):
        return (a + m - 1) // m * m

    # Batch-on-lanes layout: pad the batch to a multiple of 128 lanes, pick a
    # TB-row block (default 512, review item 3), and make sure the grid has
    # >= 2 "parallel" steps when the batch is big enough so both v7x
    # TensorCores get work (review item 4).
    b128 = rup(B, 128)
    TB = min(rup(tb, 128), b128)
    if b128 >= 2 * 128:
        TB = min(TB, rup(b128 // 2, 128))
    Bp = rup(B, TB)
    grid = Bp // TB

    x_bl = x_ncl[:, 0, :].astype(jnp.float32)                    # (B, L)
    x_lb = jnp.transpose(jnp.pad(x_bl, ((0, Bp - B), (0, 0))))   # (L, Bp)

    # conv1 taps packed as an (C1, 8) matmul operand:
    #   h1[:, l] = relu(w1a @ [x[l-1], x[l], x[l+1], 1, 0, 0, 0, 0]).
    w1a = jnp.concatenate(
        [w1[:, 0, :].astype(jnp.float32),
         b1.reshape(C1, 1).astype(jnp.float32),
         jnp.zeros((C1, 4), jnp.float32)], axis=1)               # (C1, 8)

    # conv2 weights as (C2, 3*C1), tap-major (col = k*C1 + c), with the 1/L
    # pooling scale folded in, plus a bias column and zero padding to K%8==0.
    w2t = jnp.transpose(w2.astype(jnp.float32), (0, 2, 1)).reshape(C2, 3 * C1)
    w2a = jnp.concatenate(
        [w2t * (1.0 / L),
         b2.reshape(C2, 1).astype(jnp.float32),
         jnp.zeros((C2, 7), jnp.float32)], axis=1)               # (C2, 3*C1+8)

    out_t = pl.pallas_call(
        encoder_kernel,
        out_shape=jax.ShapeDtypeStruct((C2, Bp), jnp.float32),
        grid_spec=pltpu.PrefetchScalarGridSpec(
            num_scalar_prefetch=0,
            grid=(grid,),
            in_specs=[
                pl.BlockSpec((L, TB), lambda i: (0, i)),
                # Weights are ~100 KiB total; default double-buffering costs
                # < 0.2 MiB, so no pl.Buffered(1) override is needed here.
                pl.BlockSpec((C1, 8), lambda i: (0, 0)),
                pl.BlockSpec((C2, 3 * C1 + 8), lambda i: (0, 0)),
            ],
            out_specs=pl.BlockSpec((C2, TB), lambda i: (0, i)),
        ),
        compiler_params=pltpu.CompilerParams(
            dimension_semantics=("parallel",),
            # Per-step footprint is < 8 MiB even at TB=2048; 48 MiB leaves
            # headroom under v7x's 64 MiB physical VMEM.
            vmem_limit_bytes=48 * 1024 * 1024,
        ),
    )(x_lb, w1a, w2a)

    return jnp.transpose(out_t)[:B]                              # (B, C2)


def encoder_reference(x_ncl, w1, b1, w2, b2):
    """Plain-JAX mirror of the PyTorch module (NCL layout, f32)."""
    def conv1d(x, w, b):                    # x (B, Cin, L), w (Cout, Cin, 3)
        L = x.shape[-1]
        xp = jnp.pad(x, ((0, 0), (0, 0), (1, 1)))
        cols = jnp.stack([xp[:, :, k:k + L] for k in range(3)], axis=-1)
        return jnp.einsum("bclk,ock->bol", cols, w) + b[None, :, None]
    h = jax.nn.relu(conv1d(x_ncl, w1, b1))
    y = conv1d(h, w2, b2)
    return jnp.mean(y, axis=-1)                                  # (B, 128)


if __name__ == "__main__":
    key = jax.random.PRNGKey(0)
    kx, k1, k2, k3, k4 = jax.random.split(key, 5)

    B, L = 2, 16
    x = jax.random.normal(kx, (B, 1, L), dtype=jnp.float32)

    # Deterministic synthetic parameters (shapes from the nn.Conv1d layers).
    w1 = jax.random.normal(k1, (64, 1, 3), dtype=jnp.float32) * 0.3     # Conv1d(1, 64, 3)
    b1 = jax.random.normal(k2, (64,), dtype=jnp.float32) * 0.1
    w2 = jax.random.normal(k3, (128, 64, 3), dtype=jnp.float32) * 0.05  # Conv1d(64, 128, 3)
    b2 = jax.random.normal(k4, (128,), dtype=jnp.float32) * 0.1

    out = jax.block_until_ready(encoder_forward(x, w1, b1, w2, b2))
    ref = encoder_reference(x, w1, b1, w2, b2)

    assert out.shape == (B, 128), out.shape
    max_err = float(jnp.max(jnp.abs(out - ref)))
    assert jnp.allclose(out, ref, atol=1e-4, rtol=1e-4), max_err

    print("KERNEL_OK")
</pallas_src>

<mosaic_0001>
module attributes {stable_mosaic.version = 11 : i64} {
  func.func @encoder_kernel(%arg0: i32, %arg1: memref<16x128xf32, #tpu.memory_space<vmem>>, %arg2: memref<64x8xf32, #tpu.memory_space<vmem>>, %arg3: memref<128x200xf32, #tpu.memory_space<vmem>>, %arg4: memref<128x128xf32, #tpu.memory_space<vmem>>) attributes {dimension_semantics = [#tpu.dimension_semantics<parallel>], iteration_bounds = array<i64: 1>, scalar_prefetch = 0 : i64, scratch_operands = 0 : i64, tpu.core_type = #tpu.core_type<tc>, window_params = [{transform_indices = @transform_0, window_bounds = array<i64: 16, 128>}, {pipeline_mode = #tpu.pipeline_mode<synchronous>, transform_indices = @transform_1, window_bounds = array<i64: 64, 8>}, {pipeline_mode = #tpu.pipeline_mode<synchronous>, transform_indices = @transform_2, window_bounds = array<i64: 128, 200>}, {transform_indices = @transform_3, window_bounds = array<i64: 128, 128>}]} {
    %c0 = arith.constant 0 : index
    %c0_0 = arith.constant 0 : index
    %0 = vector.load %arg2[%c0, %c0_0] : memref<64x8xf32, #tpu.memory_space<vmem>>, vector<64x8xf32>
    %cst = arith.constant 1.000000e+00 : f32
    %1 = vector.broadcast %cst : f32 to vector<1x128xf32>
    %cst_1 = arith.constant 0.000000e+00 : f32
    %2 = vector.broadcast %cst_1 : f32 to vector<4x128xf32>
    %3 = tpu.concatenate %1, %2 in 0 : vector<1x128xf32>, vector<4x128xf32> -> vector<5x128xf32>
    %cst_2 = arith.constant 0.000000e+00 : f32
    %4 = vector.broadcast %cst_2 : f32 to vector<7x128xf32>
    %5 = tpu.concatenate %1, %4 in 0 : vector<1x128xf32>, vector<7x128xf32> -> vector<8x128xf32>
    %cst_3 = arith.constant 0.000000e+00 : f32
    %6 = vector.broadcast %cst_3 : f32 to vector<64x128xf32>
    %c0_i32 = arith.constant 0 : i32
    %c0_i32_4 = arith.constant 0 : i32
    %7 = arith.cmpi sgt, %c0_i32, %c0_i32_4 : i32
    %cst_5 = arith.constant 1.000000e+00 : f32
    %cst_6 = arith.constant 0.000000e+00 : f32
    %8 = arith.select %7, %cst_5, %cst_6 : f32
    %c15_i32 = arith.constant 15 : i32
    %9 = arith.cmpi slt, %c0_i32, %c15_i32 : i32
    %cst_7 = arith.constant 1.000000e+00 : f32
    %cst_8 = arith.constant 0.000000e+00 : f32
    %10 = arith.select %9, %cst_7, %cst_8 : f32
    %c1_i32 = arith.constant 1 : i32
    %11 = arith.subi %c0_i32, %c1_i32 : i32
    %c0_i32_9 = arith.constant 0 : i32
    %12 = arith.maxsi %11, %c0_i32_9 : i32
    %13 = arith.index_cast %12 : i32 to index
    %c0_10 = arith.constant 0 : index
    %14 = vector.load %arg1[%13, %c0_10] : memref<16x128xf32, #tpu.memory_space<vmem>>, vector<1x128xf32>
    %15 = vector.broadcast %8 : f32 to vector<1x128xf32>
    %16 = arith.mulf %14, %15 : vector<1x128xf32>
    %17 = arith.index_cast %c0_i32 : i32 to index
    %c0_11 = arith.constant 0 : index
    %18 = vector.load %arg1[%17, %c0_11] : memref<16x128xf32, #tpu.memory_space<vmem>>, vector<1x128xf32>
    %c1_i32_12 = arith.constant 1 : i32
    %19 = arith.addi %c0_i32, %c1_i32_12 : i32
    %c15_i32_13 = arith.constant 15 : i32
    %20 = arith.minsi %19, %c15_i32_13 : i32
    %21 = arith.index_cast %20 : i32 to index
    %c0_14 = arith.constant 0 : index
    %22 = vector.load %arg1[%21, %c0_14] : memref<16x128xf32, #tpu.memory_space<vmem>>, vector<1x128xf32>
    %23 = vector.broadcast %10 : f32 to vector<1x128xf32>
    %24 = arith.mulf %22, %23 : vector<1x128xf32>
    %25 = tpu.concatenate %16, %18, %24, %3 in 0 : vector<1x128xf32>, vector<1x128xf32>, vector<1x128xf32>, vector<5x128xf32> -> vector<8x128xf32>
    %cst_15 = arith.constant dense<0.000000e+00> : vector<64x128xf32>
    %26 = tpu.matmul %0, %25, %cst_15 {dimension_numbers = #tpu.dot_dimension_numbers<[1], [0], [0], [1], [0, 0, 1, 1], [], []>} : vector<64x8xf32>, vector<8x128xf32>, vector<64x128xf32> -> vector<64x128xf32>
    %cst_16 = arith.constant 0.000000e+00 : f32
    %27 = vector.broadcast %cst_16 : f32 to vector<64x128xf32>
    %28 = arith.maximumf %26, %27 : vector<64x128xf32>
    %29 = arith.addf %6, %28 : vector<64x128xf32>
    %c1_i32_17 = arith.constant 1 : i32
    %c0_i32_18 = arith.constant 0 : i32
    %30 = arith.cmpi sgt, %c1_i32_17, %c0_i32_18 : i32
    %cst_19 = arith.constant 1.000000e+00 : f32
    %cst_20 = arith.constant 0.000000e+00 : f32
    %31 = arith.select %30, %cst_19, %cst_20 : f32
    %c15_i32_21 = arith.constant 15 : i32
    %32 = arith.cmpi slt, %c1_i32_17, %c15_i32_21 : i32
    %cst_22 = arith.constant 1.000000e+00 : f32
    %cst_23 = arith.constant 0.000000e+00 : f32
    %33 = arith.select %32, %cst_22, %cst_23 : f32
    %c1_i32_24 = arith.constant 1 : i32
    %34 = arith.subi %c1_i32_17, %c1_i32_24 : i32
    %c0_i32_25 = arith.constant 0 : i32
    %35 = arith.maxsi %34, %c0_i32_25 : i32
    %36 = arith.index_cast %35 : i32 to index
    %c0_26 = arith.constant 0 : index
    %37 = vector.load %arg1[%36, %c0_26] : memref<16x128xf32, #tpu.memory_space<vmem>>, vector<1x128xf32>
    %38 = vector.broadcast %31 : f32 to vector<1x128xf32>
    %39 = arith.mulf %37, %38 : vector<1x128xf32>
    %40 = arith.index_cast %c1_i32_17 : i32 to index
    %c0_27 = arith.constant 0 : index
    %41 = vector.load %arg1[%40, %c0_27] : memref<16x128xf32, #tpu.memory_space<vmem>>, vector<1x128xf32>
    %c1_i32_28 = arith.constant 1 : i32
    %42 = arith.addi %c1_i32_17, %c1_i32_28 : i32
    %c15_i32_29 = arith.constant 15 : i32
    %43 = arith.minsi %42, %c15_i32_29 : i32
    %44 = arith.index_cast %43 : i32 to index
    %c0_30 = arith.constant 0 : index
    %45 = vector.load %arg1[%44, %c0_30] : memref<16x128xf32, #tpu.memory_space<vmem>>, vector<1x128xf32>
    %46 = vector.broadcast %33 : f32 to vector<1x128xf32>
    %47 = arith.mulf %45, %46 : vector<1x128xf32>
    %48 = tpu.concatenate %39, %41, %47, %3 in 0 : vector<1x128xf32>, vector<1x128xf32>, vector<1x128xf32>, vector<5x128xf32> -> vector<8x128xf32>
    %cst_31 = arith.constant dense<0.000000e+00> : vector<64x128xf32>
    %49 = tpu.matmul %0, %48, %cst_31 {dimension_numbers = #tpu.dot_dimension_numbers<[1], [0], [0], [1], [0, 0, 1, 1], [], []>} : vector<64x8xf32>, vector<8x128xf32>, vector<64x128xf32> -> vector<64x128xf32>
    %cst_32 = arith.constant 0.000000e+00 : f32
    %50 = vector.broadcast %cst_32 : f32 to vector<64x128xf32>
    %51 = arith.maximumf %49, %50 : vector<64x128xf32>
    %52 = arith.addf %29, %51 : vector<64x128xf32>
    %c2_i32 = arith.constant 2 : i32
    %c0_i32_33 = arith.constant 0 : i32
    %53 = arith.cmpi sgt, %c2_i32, %c0_i32_33 : i32
    %cst_34 = arith.constant 1.000000e+00 : f32
    %cst_35 = arith.constant 0.000000e+00 : f32
    %54 = arith.select %53, %cst_34, %cst_35 : f32
    %c15_i32_36 = arith.constant 15 : i32
    %55 = arith.cmpi slt, %c2_i32, %c15_i32_36 : i32
    %cst_37 = arith.constant 1.000000e+00 : f32
    %cst_38 = arith.constant 0.000000e+00 : f32
    %56 = arith.select %55, %cst_37, %cst_38 : f32
    %c1_i32_39 = arith.constant 1 : i32
    %57 = arith.subi %c2_i32, %c1_i32_39 : i32
    %c0_i32_40 = arith.constant 0 : i32
    %58 = arith.maxsi %57, %c0_i32_40 : i32
    %59 = arith.index_cast %58 : i32 to index
    %c0_41 = arith.constant 0 : index
    %60 = vector.load %arg1[%59, %c0_41] : memref<16x128xf32, #tpu.memory_space<vmem>>, vector<1x128xf32>
    %61 = vector.broadcast %54 : f32 to vector<1x128xf32>
    %62 = arith.mulf %60, %61 : vector<1x128xf32>
    %63 = arith.index_cast %c2_i32 : i32 to index
    %c0_42 = arith.constant 0 : index
    %64 = vector.load %arg1[%63, %c0_42] : memref<16x128xf32, #tpu.memory_space<vmem>>, vector<1x128xf32>
    %c1_i32_43 = arith.constant 1 : i32
    %65 = arith.addi %c2_i32, %c1_i32_43 : i32
    %c15_i32_44 = arith.constant 15 : i32
    %66 = arith.minsi %65, %c15_i32_44 : i32
    %67 = arith.index_cast %66 : i32 to index
    %c0_45 = arith.constant 0 : index
    %68 = vector.load %arg1[%67, %c0_45] : memref<16x128xf32, #tpu.memory_space<vmem>>, vector<1x128xf32>
    %69 = vector.broadcast %56 : f32 to vector<1x128xf32>
    %70 = arith.mulf %68, %69 : vector<1x128xf32>
    %71 = tpu.concatenate %62, %64, %70, %3 in 0 : vector<1x128xf32>, vector<1x128xf32>, vector<1x128xf32>, vector<5x128xf32> -> vector<8x128xf32>
    %cst_46 = arith.constant dense<0.000000e+00> : vector<64x128xf32>
    %72 = tpu.matmul %0, %71, %cst_46 {dimension_numbers = #tpu.dot_dimension_numbers<[1], [0], [0], [1], [0, 0, 1, 1], [], []>} : vector<64x8xf32>, vector<8x128xf32>, vector<64x128xf32> -> vector<64x128xf32>
    %cst_47 = arith.constant 0.000000e+00 : f32
    %73 = vector.broadcast %cst_47 : f32 to vector<64x128xf32>
    %74 = arith.maximumf %72, %73 : vector<64x128xf32>
    %75 = arith.addf %52, %74 : vector<64x128xf32>
    %c3_i32 = arith.constant 3 : i32
    %c0_i32_48 = arith.constant 0 : i32
    %76 = arith.cmpi sgt, %c3_i32, %c0_i32_48 : i32
    %cst_49 = arith.constant 1.000000e+00 : f32
    %cst_50 = arith.constant 0.000000e+00 : f32
    %77 = arith.select %76, %cst_49, %cst_50 : f32
    %c15_i32_51 = arith.constant 15 : i32
    %78 = arith.cmpi slt, %c3_i32, %c15_i32_51 : i32
    %cst_52 = arith.constant 1.000000e+00 : f32
    %cst_53 = arith.constant 0.000000e+00 : f32
    %79 = arith.select %78, %cst_52, %cst_53 : f32
    %c1_i32_54 = arith.constant 1 : i32
    %80 = arith.subi %c3_i32, %c1_i32_54 : i32
    %c0_i32_55 = arith.constant 0 : i32
    %81 = arith.maxsi %80, %c0_i32_55 : i32
    %82 = arith.index_cast %81 : i32 to index
    %c0_56 = arith.constant 0 : index
    %83 = vector.load %arg1[%82, %c0_56] : memref<16x128xf32, #tpu.memory_space<vmem>>, vector<1x128xf32>
    %84 = vector.broadcast %77 : f32 to vector<1x128xf32>
    %85 = arith.mulf %83, %84 : vector<1x128xf32>
    %86 = arith.index_cast %c3_i32 : i32 to index
    %c0_57 = arith.constant 0 : index
    %87 = vector.load %arg1[%86, %c0_57] : memref<16x128xf32, #tpu.memory_space<vmem>>, vector<1x128xf32>
    %c1_i32_58 = arith.constant 1 : i32
    %88 = arith.addi %c3_i32, %c1_i32_58 : i32
    %c15_i32_59 = arith.constant 15 : i32
    %89 = arith.minsi %88, %c15_i32_59 : i32
    %90 = arith.index_cast %89 : i32 to index
    %c0_60 = arith.constant 0 : index
    %91 = vector.load %arg1[%90, %c0_60] : memref<16x128xf32, #tpu.memory_space<vmem>>, vector<1x128xf32>
    %92 = vector.broadcast %79 : f32 to vector<1x128xf32>
    %93 = arith.mulf %91, %92 : vector<1x128xf32>
    %94 = tpu.concatenate %85, %87, %93, %3 in 0 : vector<1x128xf32>, vector<1x128xf32>, vector<1x128xf32>, vector<5x128xf32> -> vector<8x128xf32>
    %cst_61 = arith.constant dense<0.000000e+00> : vector<64x128xf32>
    %95 = tpu.matmul %0, %94, %cst_61 {dimension_numbers = #tpu.dot_dimension_numbers<[1], [0], [0], [1], [0, 0, 1, 1], [], []>} : vector<64x8xf32>, vector<8x128xf32>, vector<64x128xf32> -> vector<64x128xf32>
    %cst_62 = arith.constant 0.000000e+00 : f32
    %96 = vector.broadcast %cst_62 : f32 to vector<64x128xf32>
    %97 = arith.maximumf %95, %96 : vector<64x128xf32>
    %98 = arith.addf %75, %97 : vector<64x128xf32>
    %c4_i32 = arith.constant 4 : i32
    %c0_i32_63 = arith.constant 0 : i32
    %99 = arith.cmpi sgt, %c4_i32, %c0_i32_63 : i32
    %cst_64 = arith.constant 1.000000e+00 : f32
    %cst_65 = arith.constant 0.000000e+00 : f32
    %100 = arith.select %99, %cst_64, %cst_65 : f32
    %c15_i32_66 = arith.constant 15 : i32
    %101 = arith.cmpi slt, %c4_i32, %c15_i32_66 : i32
    %cst_67 = arith.constant 1.000000e+00 : f32
    %cst_68 = arith.constant 0.000000e+00 : f32
    %102 = arith.select %101, %cst_67, %cst_68 : f32
    %c1_i32_69 = arith.constant 1 : i32
    %103 = arith.subi %c4_i32, %c1_i32_69 : i32
    %c0_i32_70 = arith.constant 0 : i32
    %104 = arith.maxsi %103, %c0_i32_70 : i32
    %105 = arith.index_cast %104 : i32 to index
    %c0_71 = arith.constant 0 : index
    %106 = vector.load %arg1[%105, %c0_71] : memref<16x128xf32, #tpu.memory_space<vmem>>, vector<1x128xf32>
    %107 = vector.broadcast %100 : f32 to vector<1x128xf32>
    %108 = arith.mulf %106, %107 : vector<1x128xf32>
    %109 = arith.index_cast %c4_i32 : i32 to index
    %c0_72 = arith.constant 0 : index
    %110 = vector.load %arg1[%109, %c0_72] : memref<16x128xf32, #tpu.memory_space<vmem>>, vector<1x128xf32>
    %c1_i32_73 = arith.constant 1 : i32
    %111 = arith.addi %c4_i32, %c1_i32_73 : i32
    %c15_i32_74 = arith.constant 15 : i32
    %112 = arith.minsi %111, %c15_i32_74 : i32
    %113 = arith.index_cast %112 : i32 to index
    %c0_75 = arith.constant 0 : index
    %114 = vector.load %arg1[%113, %c0_75] : memref<16x128xf32, #tpu.memory_space<vmem>>, vector<1x128xf32>
    %115 = vector.broadcast %102 : f32 to vector<1x128xf32>
    %116 = arith.mulf %114, %115 : vector<1x128xf32>
    %117 = tpu.concatenate %108, %110, %116, %3 in 0 : vector<1x128xf32>, vector<1x128xf32>, vector<1x128xf32>, vector<5x128xf32> -> vector<8x128xf32>
    %cst_76 = arith.constant dense<0.000000e+00> : vector<64x128xf32>
    %118 = tpu.matmul %0, %117, %cst_76 {dimension_numbers = #tpu.dot_dimension_numbers<[1], [0], [0], [1], [0, 0, 1, 1], [], []>} : vector<64x8xf32>, vector<8x128xf32>, vector<64x128xf32> -> vector<64x128xf32>
    %cst_77 = arith.constant 0.000000e+00 : f32
    %119 = vector.broadcast %cst_77 : f32 to vector<64x128xf32>
    %120 = arith.maximumf %118, %119 : vector<64x128xf32>
    %121 = arith.addf %98, %120 : vector<64x128xf32>
    %c5_i32 = arith.constant 5 : i32
    %c0_i32_78 = arith.constant 0 : i32
    %122 = arith.cmpi sgt, %c5_i32, %c0_i32_78 : i32
    %cst_79 = arith.constant 1.000000e+00 : f32
    %cst_80 = arith.constant 0.000000e+00 : f32
    %123 = arith.select %122, %cst_79, %cst_80 : f32
    %c15_i32_81 = arith.constant 15 : i32
    %124 = arith.cmpi slt, %c5_i32, %c15_i32_81 : i32
    %cst_82 = arith.constant 1.000000e+00 : f32
    %cst_83 = arith.constant 0.000000e+00 : f32
    %125 = arith.select %124, %cst_82, %cst_83 : f32
    %c1_i32_84 = arith.constant 1 : i32
    %126 = arith.subi %c5_i32, %c1_i32_84 : i32
    %c0_i32_85 = arith.constant 0 : i32
    %127 = arith.maxsi %126, %c0_i32_85 : i32
    %128 = arith.index_cast %127 : i32 to index
    %c0_86 = arith.constant 0 : index
    %129 = vector.load %arg1[%128, %c0_86] : memref<16x128xf32, #tpu.memory_space<vmem>>, vector<1x128xf32>
    %130 = vector.broadcast %123 : f32 to vector<1x128xf32>
    %131 = arith.mulf %129, %130 : vector<1x128xf32>
    %132 = arith.index_cast %c5_i32 : i32 to index
    %c0_87 = arith.constant 0 : index
    %133 = vector.load %arg1[%132, %c0_87] : memref<16x128xf32, #tpu.memory_space<vmem>>, vector<1x128xf32>
    %c1_i32_88 = arith.constant 1 : i32
    %134 = arith.addi %c5_i32, %c1_i32_88 : i32
    %c15_i32_89 = arith.constant 15 : i32
    %135 = arith.minsi %134, %c15_i32_89 : i32
    %136 = arith.index_cast %135 : i32 to index
    %c0_90 = arith.constant 0 : index
    %137 = vector.load %arg1[%136, %c0_90] : memref<16x128xf32, #tpu.memory_space<vmem>>, vector<1x128xf32>
    %138 = vector.broadcast %125 : f32 to vector<1x128xf32>
    %139 = arith.mulf %137, %138 : vector<1x128xf32>
    %140 = tpu.concatenate %131, %133, %139, %3 in 0 : vector<1x128xf32>, vector<1x128xf32>, vector<1x128xf32>, vector<5x128xf32> -> vector<8x128xf32>
    %cst_91 = arith.constant dense<0.000000e+00> : vector<64x128xf32>
    %141 = tpu.matmul %0, %140, %cst_91 {dimension_numbers = #tpu.dot_dimension_numbers<[1], [0], [0], [1], [0, 0, 1, 1], [], []>} : vector<64x8xf32>, vector<8x128xf32>, vector<64x128xf32> -> vector<64x128xf32>
    %cst_92 = arith.constant 0.000000e+00 : f32
    %142 = vector.broadcast %cst_92 : f32 to vector<64x128xf32>
    %143 = arith.maximumf %141, %142 : vector<64x128xf32>
    %144 = arith.addf %121, %143 : vector<64x128xf32>
    %c6_i32 = arith.constant 6 : i32
    %c0_i32_93 = arith.constant 0 : i32
    %145 = arith.cmpi sgt, %c6_i32, %c0_i32_93 : i32
    %cst_94 = arith.constant 1.000000e+00 : f32
    %cst_95 = arith.constant 0.000000e+00 : f32
    %146 = arith.select %145, %cst_94, %cst_95 : f32
    %c15_i32_96 = arith.constant 15 : i32
    %147 = arith.cmpi slt, %c6_i32, %c15_i32_96 : i32
    %cst_97 = arith.constant 1.000000e+00 : f32
    %cst_98 = arith.constant 0.000000e+00 : f32
    %148 = arith.select %147, %cst_97, %cst_98 : f32
    %c1_i32_99 = arith.constant 1 : i32
    %149 = arith.subi %c6_i32, %c1_i32_99 : i32
    %c0_i32_100 = arith.constant 0 : i32
    %150 = arith.maxsi %149, %c0_i32_100 : i32
    %151 = arith.index_cast %150 : i32 to index
    %c0_101 = arith.constant 0 : index
    %152 = vector.load %arg1[%151, %c0_101] : memref<16x128xf32, #tpu.memory_space<vmem>>, vector<1x128xf32>
    %153 = vector.broadcast %146 : f32 to vector<1x128xf32>
    %154 = arith.mulf %152, %153 : vector<1x128xf32>
    %155 = arith.index_cast %c6_i32 : i32 to index
    %c0_102 = arith.constant 0 : index
    %156 = vector.load %arg1[%155, %c0_102] : memref<16x128xf32, #tpu.memory_space<vmem>>, vector<1x128xf32>
    %c1_i32_103 = arith.constant 1 : i32
    %157 = arith.addi %c6_i32, %c1_i32_103 : i32
    %c15_i32_104 = arith.constant 15 : i32
    %158 = arith.minsi %157, %c15_i32_104 : i32
    %159 = arith.index_cast %158 : i32 to index
    %c0_105 = arith.constant 0 : index
    %160 = vector.load %arg1[%159, %c0_105] : memref<16x128xf32, #tpu.memory_space<vmem>>, vector<1x128xf32>
    %161 = vector.broadcast %148 : f32 to vector<1x128xf32>
    %162 = arith.mulf %160, %161 : vector<1x128xf32>
    %163 = tpu.concatenate %154, %156, %162, %3 in 0 : vector<1x128xf32>, vector<1x128xf32>, vector<1x128xf32>, vector<5x128xf32> -> vector<8x128xf32>
    %cst_106 = arith.constant dense<0.000000e+00> : vector<64x128xf32>
    %164 = tpu.matmul %0, %163, %cst_106 {dimension_numbers = #tpu.dot_dimension_numbers<[1], [0], [0], [1], [0, 0, 1, 1], [], []>} : vector<64x8xf32>, vector<8x128xf32>, vector<64x128xf32> -> vector<64x128xf32>
    %cst_107 = arith.constant 0.000000e+00 : f32
    %165 = vector.broadcast %cst_107 : f32 to vector<64x128xf32>
    %166 = arith.maximumf %164, %165 : vector<64x128xf32>
    %167 = arith.addf %144, %166 : vector<64x128xf32>
    %c7_i32 = arith.constant 7 : i32
    %c0_i32_108 = arith.constant 0 : i32
    %168 = arith.cmpi sgt, %c7_i32, %c0_i32_108 : i32
    %cst_109 = arith.constant 1.000000e+00 : f32
    %cst_110 = arith.constant 0.000000e+00 : f32
    %169 = arith.select %168, %cst_109, %cst_110 : f32
    %c15_i32_111 = arith.constant 15 : i32
    %170 = arith.cmpi slt, %c7_i32, %c15_i32_111 : i32
    %cst_112 = arith.constant 1.000000e+00 : f32
    %cst_113 = arith.constant 0.000000e+00 : f32
    %171 = arith.select %170, %cst_112, %cst_113 : f32
    %c1_i32_114 = arith.constant 1 : i32
    %172 = arith.subi %c7_i32, %c1_i32_114 : i32
    %c0_i32_115 = arith.constant 0 : i32
    %173 = arith.maxsi %172, %c0_i32_115 : i32
    %174 = arith.index_cast %173 : i32 to index
    %c0_116 = arith.constant 0 : index
    %175 = vector.load %arg1[%174, %c0_116] : memref<16x128xf32, #tpu.memory_space<vmem>>, vector<1x128xf32>
    %176 = vector.broadcast %169 : f32 to vector<1x128xf32>
    %177 = arith.mulf %175, %176 : vector<1x128xf32>
    %178 = arith.index_cast %c7_i32 : i32 to index
    %c0_117 = arith.constant 0 : index
    %179 = vector.load %arg1[%178, %c0_117] : memref<16x128xf32, #tpu.memory_space<vmem>>, vector<1x128xf32>
    %c1_i32_118 = arith.constant 1 : i32
    %180 = arith.addi %c7_i32, %c1_i32_118 : i32
    %c15_i32_119 = arith.constant 15 : i32
    %181 = arith.minsi %180, %c15_i32_119 : i32
    %182 = arith.index_cast %181 : i32 to index
    %c0_120 = arith.constant 0 : index
    %183 = vector.load %arg1[%182, %c0_120] : memref<16x128xf32, #tpu.memory_space<vmem>>, vector<1x128xf32>
    %184 = vector.broadcast %171 : f32 to vector<1x128xf32>
    %185 = arith.mulf %183, %184 : vector<1x128xf32>
    %186 = tpu.concatenate %177, %179, %185, %3 in 0 : vector<1x128xf32>, vector<1x128xf32>, vector<1x128xf32>, vector<5x128xf32> -> vector<8x128xf32>
    %cst_121 = arith.constant dense<0.000000e+00> : vector<64x128xf32>
    %187 = tpu.matmul %0, %186, %cst_121 {dimension_numbers = #tpu.dot_dimension_numbers<[1], [0], [0], [1], [0, 0, 1, 1], [], []>} : vector<64x8xf32>, vector<8x128xf32>, vector<64x128xf32> -> vector<64x128xf32>
    %cst_122 = arith.constant 0.000000e+00 : f32
    %188 = vector.broadcast %cst_122 : f32 to vector<64x128xf32>
    %189 = arith.maximumf %187, %188 : vector<64x128xf32>
    %190 = arith.addf %167, %189 : vector<64x128xf32>
    %c8_i32 = arith.constant 8 : i32
    %c0_i32_123 = arith.constant 0 : i32
    %191 = arith.cmpi sgt, %c8_i32, %c0_i32_123 : i32
    %cst_124 = arith.constant 1.000000e+00 : f32
    %cst_125 = arith.constant 0.000000e+00 : f32
    %192 = arith.select %191, %cst_124, %cst_125 : f32
    %c15_i32_126 = arith.constant 15 : i32
    %193 = arith.cmpi slt, %c8_i32, %c15_i32_126 : i32
    %cst_127 = arith.constant 1.000000e+00 : f32
    %cst_128 = arith.constant 0.000000e+00 : f32
    %194 = arith.select %193, %cst_127, %cst_128 : f32
    %c1_i32_129 = arith.constant 1 : i32
    %195 = arith.subi %c8_i32, %c1_i32_129 : i32
    %c0_i32_130 = arith.constant 0 : i32
    %196 = arith.maxsi %195, %c0_i32_130 : i32
    %197 = arith.index_cast %196 : i32 to index
    %c0_131 = arith.constant 0 : index
    %198 = vector.load %arg1[%197, %c0_131] : memref<16x128xf32, #tpu.memory_space<vmem>>, vector<1x128xf32>
    %199 = vector.broadcast %192 : f32 to vector<1x128xf32>
    %200 = arith.mulf %198, %199 : vector<1x128xf32>
    %201 = arith.index_cast %c8_i32 : i32 to index
    %c0_132 = arith.constant 0 : index
    %202 = vector.load %arg1[%201, %c0_132] : memref<16x128xf32, #tpu.memory_space<vmem>>, vector<1x128xf32>
    %c1_i32_133 = arith.constant 1 : i32
    %203 = arith.addi %c8_i32, %c1_i32_133 : i32
    %c15_i32_134 = arith.constant 15 : i32
    %204 = arith.minsi %203, %c15_i32_134 : i32
    %205 = arith.index_cast %204 : i32 to index
    %c0_135 = arith.constant 0 : index
    %206 = vector.load %arg1[%205, %c0_135] : memref<16x128xf32, #tpu.memory_space<vmem>>, vector<1x128xf32>
    %207 = vector.broadcast %194 : f32 to vector<1x128xf32>
    %208 = arith.mulf %206, %207 : vector<1x128xf32>
    %209 = tpu.concatenate %200, %202, %208, %3 in 0 : vector<1x128xf32>, vector<1x128xf32>, vector<1x128xf32>, vector<5x128xf32> -> vector<8x128xf32>
    %cst_136 = arith.constant dense<0.000000e+00> : vector<64x128xf32>
    %210 = tpu.matmul %0, %209, %cst_136 {dimension_numbers = #tpu.dot_dimension_numbers<[1], [0], [0], [1], [0, 0, 1, 1], [], []>} : vector<64x8xf32>, vector<8x128xf32>, vector<64x128xf32> -> vector<64x128xf32>
    %cst_137 = arith.constant 0.000000e+00 : f32
    %211 = vector.broadcast %cst_137 : f32 to vector<64x128xf32>
    %212 = arith.maximumf %210, %211 : vector<64x128xf32>
    %213 = arith.addf %190, %212 : vector<64x128xf32>
    %c9_i32 = arith.constant 9 : i32
    %c0_i32_138 = arith.constant 0 : i32
    %214 = arith.cmpi sgt, %c9_i32, %c0_i32_138 : i32
    %cst_139 = arith.constant 1.000000e+00 : f32
    %cst_140 = arith.constant 0.000000e+00 : f32
    %215 = arith.select %214, %cst_139, %cst_140 : f32
    %c15_i32_141 = arith.constant 15 : i32
    %216 = arith.cmpi slt, %c9_i32, %c15_i32_141 : i32
    %cst_142 = arith.constant 1.000000e+00 : f32
    %cst_143 = arith.constant 0.000000e+00 : f32
    %217 = arith.select %216, %cst_142, %cst_143 : f32
    %c1_i32_144 = arith.constant 1 : i32
    %218 = arith.subi %c9_i32, %c1_i32_144 : i32
    %c0_i32_145 = arith.constant 0 : i32
    %219 = arith.maxsi %218, %c0_i32_145 : i32
    %220 = arith.index_cast %219 : i32 to index
    %c0_146 = arith.constant 0 : index
    %221 = vector.load %arg1[%220, %c0_146] : memref<16x128xf32, #tpu.memory_space<vmem>>, vector<1x128xf32>
    %222 = vector.broadcast %215 : f32 to vector<1x128xf32>
    %223 = arith.mulf %221, %222 : vector<1x128xf32>
    %224 = arith.index_cast %c9_i32 : i32 to index
    %c0_147 = arith.constant 0 : index
    %225 = vector.load %arg1[%224, %c0_147] : memref<16x128xf32, #tpu.memory_space<vmem>>, vector<1x128xf32>
    %c1_i32_148 = arith.constant 1 : i32
    %226 = arith.addi %c9_i32, %c1_i32_148 : i32
    %c15_i32_149 = arith.constant 15 : i32
    %227 = arith.minsi %226, %c15_i32_149 : i32
    %228 = arith.index_cast %227 : i32 to index
    %c0_150 = arith.constant 0 : index
    %229 = vector.load %arg1[%228, %c0_150] : memref<16x128xf32, #tpu.memory_space<vmem>>, vector<1x128xf32>
    %230 = vector.broadcast %217 : f32 to vector<1x128xf32>
    %231 = arith.mulf %229, %230 : vector<1x128xf32>
    %232 = tpu.concatenate %223, %225, %231, %3 in 0 : vector<1x128xf32>, vector<1x128xf32>, vector<1x128xf32>, vector<5x128xf32> -> vector<8x128xf32>
    %cst_151 = arith.constant dense<0.000000e+00> : vector<64x128xf32>
    %233 = tpu.matmul %0, %232, %cst_151 {dimension_numbers = #tpu.dot_dimension_numbers<[1], [0], [0], [1], [0, 0, 1, 1], [], []>} : vector<64x8xf32>, vector<8x128xf32>, vector<64x128xf32> -> vector<64x128xf32>
    %cst_152 = arith.constant 0.000000e+00 : f32
    %234 = vector.broadcast %cst_152 : f32 to vector<64x128xf32>
    %235 = arith.maximumf %233, %234 : vector<64x128xf32>
    %236 = arith.addf %213, %235 : vector<64x128xf32>
    %c10_i32 = arith.constant 10 : i32
    %c0_i32_153 = arith.constant 0 : i32
    %237 = arith.cmpi sgt, %c10_i32, %c0_i32_153 : i32
    %cst_154 = arith.constant 1.000000e+00 : f32
    %cst_155 = arith.constant 0.000000e+00 : f32
    %238 = arith.select %237, %cst_154, %cst_155 : f32
    %c15_i32_156 = arith.constant 15 : i32
    %239 = arith.cmpi slt, %c10_i32, %c15_i32_156 : i32
    %cst_157 = arith.constant 1.000000e+00 : f32
    %cst_158 = arith.constant 0.000000e+00 : f32
    %240 = arith.select %239, %cst_157, %cst_158 : f32
    %c1_i32_159 = arith.constant 1 : i32
    %241 = arith.subi %c10_i32, %c1_i32_159 : i32
    %c0_i32_160 = arith.constant 0 : i32
    %242 = arith.maxsi %241, %c0_i32_160 : i32
    %243 = arith.index_cast %242 : i32 to index
    %c0_161 = arith.constant 0 : index
    %244 = vector.load %arg1[%243, %c0_161] : memref<16x128xf32, #tpu.memory_space<vmem>>, vector<1x128xf32>
    %245 = vector.broadcast %238 : f32 to vector<1x128xf32>
    %246 = arith.mulf %244, %245 : vector<1x128xf32>
    %247 = arith.index_cast %c10_i32 : i32 to index
    %c0_162 = arith.constant 0 : index
    %248 = vector.load %arg1[%247, %c0_162] : memref<16x128xf32, #tpu.memory_space<vmem>>, vector<1x128xf32>
    %c1_i32_163 = arith.constant 1 : i32
    %249 = arith.addi %c10_i32, %c1_i32_163 : i32
    %c15_i32_164 = arith.constant 15 : i32
    %250 = arith.minsi %249, %c15_i32_164 : i32
    %251 = arith.index_cast %250 : i32 to index
    %c0_165 = arith.constant 0 : index
    %252 = vector.load %arg1[%251, %c0_165] : memref<16x128xf32, #tpu.memory_space<vmem>>, vector<1x128xf32>
    %253 = vector.broadcast %240 : f32 to vector<1x128xf32>
    %254 = arith.mulf %252, %253 : vector<1x128xf32>
    %255 = tpu.concatenate %246, %248, %254, %3 in 0 : vector<1x128xf32>, vector<1x128xf32>, vector<1x128xf32>, vector<5x128xf32> -> vector<8x128xf32>
    %cst_166 = arith.constant dense<0.000000e+00> : vector<64x128xf32>
    %256 = tpu.matmul %0, %255, %cst_166 {dimension_numbers = #tpu.dot_dimension_numbers<[1], [0], [0], [1], [0, 0, 1, 1], [], []>} : vector<64x8xf32>, vector<8x128xf32>, vector<64x128xf32> -> vector<64x128xf32>
    %cst_167 = arith.constant 0.000000e+00 : f32
    %257 = vector.broadcast %cst_167 : f32 to vector<64x128xf32>
    %258 = arith.maximumf %256, %257 : vector<64x128xf32>
    %259 = arith.addf %236, %258 : vector<64x128xf32>
    %c11_i32 = arith.constant 11 : i32
    %c0_i32_168 = arith.constant 0 : i32
    %260 = arith.cmpi sgt, %c11_i32, %c0_i32_168 : i32
    %cst_169 = arith.constant 1.000000e+00 : f32
    %cst_170 = arith.constant 0.000000e+00 : f32
    %261 = arith.select %260, %cst_169, %cst_170 : f32
    %c15_i32_171 = arith.constant 15 : i32
    %262 = arith.cmpi slt, %c11_i32, %c15_i32_171 : i32
    %cst_172 = arith.constant 1.000000e+00 : f32
    %cst_173 = arith.constant 0.000000e+00 : f32
    %263 = arith.select %262, %cst_172, %cst_173 : f32
    %c1_i32_174 = arith.constant 1 : i32
    %264 = arith.subi %c11_i32, %c1_i32_174 : i32
    %c0_i32_175 = arith.constant 0 : i32
    %265 = arith.maxsi %264, %c0_i32_175 : i32
    %266 = arith.index_cast %265 : i32 to index
    %c0_176 = arith.constant 0 : index
    %267 = vector.load %arg1[%266, %c0_176] : memref<16x128xf32, #tpu.memory_space<vmem>>, vector<1x128xf32>
    %268 = vector.broadcast %261 : f32 to vector<1x128xf32>
    %269 = arith.mulf %267, %268 : vector<1x128xf32>
    %270 = arith.index_cast %c11_i32 : i32 to index
    %c0_177 = arith.constant 0 : index
    %271 = vector.load %arg1[%270, %c0_177] : memref<16x128xf32, #tpu.memory_space<vmem>>, vector<1x128xf32>
    %c1_i32_178 = arith.constant 1 : i32
    %272 = arith.addi %c11_i32, %c1_i32_178 : i32
    %c15_i32_179 = arith.constant 15 : i32
    %273 = arith.minsi %272, %c15_i32_179 : i32
    %274 = arith.index_cast %273 : i32 to index
    %c0_180 = arith.constant 0 : index
    %275 = vector.load %arg1[%274, %c0_180] : memref<16x128xf32, #tpu.memory_space<vmem>>, vector<1x128xf32>
    %276 = vector.broadcast %263 : f32 to vector<1x128xf32>
    %277 = arith.mulf %275, %276 : vector<1x128xf32>
    %278 = tpu.concatenate %269, %271, %277, %3 in 0 : vector<1x128xf32>, vector<1x128xf32>, vector<1x128xf32>, vector<5x128xf32> -> vector<8x128xf32>
    %cst_181 = arith.constant dense<0.000000e+00> : vector<64x128xf32>
    %279 = tpu.matmul %0, %278, %cst_181 {dimension_numbers = #tpu.dot_dimension_numbers<[1], [0], [0], [1], [0, 0, 1, 1], [], []>} : vector<64x8xf32>, vector<8x128xf32>, vector<64x128xf32> -> vector<64x128xf32>
    %cst_182 = arith.constant 0.000000e+00 : f32
    %280 = vector.broadcast %cst_182 : f32 to vector<64x128xf32>
    %281 = arith.maximumf %279, %280 : vector<64x128xf32>
    %282 = arith.addf %259, %281 : vector<64x128xf32>
    %c12_i32 = arith.constant 12 : i32
    %c0_i32_183 = arith.constant 0 : i32
    %283 = arith.cmpi sgt, %c12_i32, %c0_i32_183 : i32
    %cst_184 = arith.constant 1.000000e+00 : f32
    %cst_185 = arith.constant 0.000000e+00 : f32
    %284 = arith.select %283, %cst_184, %cst_185 : f32
    %c15_i32_186 = arith.constant 15 : i32
    %285 = arith.cmpi slt, %c12_i32, %c15_i32_186 : i32
    %cst_187 = arith.constant 1.000000e+00 : f32
    %cst_188 = arith.constant 0.000000e+00 : f32
    %286 = arith.select %285, %cst_187, %cst_188 : f32
    %c1_i32_189 = arith.constant 1 : i32
    %287 = arith.subi %c12_i32, %c1_i32_189 : i32
    %c0_i32_190 = arith.constant 0 : i32
    %288 = arith.maxsi %287, %c0_i32_190 : i32
    %289 = arith.index_cast %288 : i32 to index
    %c0_191 = arith.constant 0 : index
    %290 = vector.load %arg1[%289, %c0_191] : memref<16x128xf32, #tpu.memory_space<vmem>>, vector<1x128xf32>
    %291 = vector.broadcast %284 : f32 to vector<1x128xf32>
    %292 = arith.mulf %290, %291 : vector<1x128xf32>
    %293 = arith.index_cast %c12_i32 : i32 to index
    %c0_192 = arith.constant 0 : index
    %294 = vector.load %arg1[%293, %c0_192] : memref<16x128xf32, #tpu.memory_space<vmem>>, vector<1x128xf32>
    %c1_i32_193 = arith.constant 1 : i32
    %295 = arith.addi %c12_i32, %c1_i32_193 : i32
    %c15_i32_194 = arith.constant 15 : i32
    %296 = arith.minsi %295, %c15_i32_194 : i32
    %297 = arith.index_cast %296 : i32 to index
    %c0_195 = arith.constant 0 : index
    %298 = vector.load %arg1[%297, %c0_195] : memref<16x128xf32, #tpu.memory_space<vmem>>, vector<1x128xf32>
    %299 = vector.broadcast %286 : f32 to vector<1x128xf32>
    %300 = arith.mulf %298, %299 : vector<1x128xf32>
    %301 = tpu.concatenate %292, %294, %300, %3 in 0 : vector<1x128xf32>, vector<1x128xf32>, vector<1x128xf32>, vector<5x128xf32> -> vector<8x128xf32>
    %cst_196 = arith.constant dense<0.000000e+00> : vector<64x128xf32>
    %302 = tpu.matmul %0, %301, %cst_196 {dimension_numbers = #tpu.dot_dimension_numbers<[1], [0], [0], [1], [0, 0, 1, 1], [], []>} : vector<64x8xf32>, vector<8x128xf32>, vector<64x128xf32> -> vector<64x128xf32>
    %cst_197 = arith.constant 0.000000e+00 : f32
    %303 = vector.broadcast %cst_197 : f32 to vector<64x128xf32>
    %304 = arith.maximumf %302, %303 : vector<64x128xf32>
    %305 = arith.addf %282, %304 : vector<64x128xf32>
    %c13_i32 = arith.constant 13 : i32
    %c0_i32_198 = arith.constant 0 : i32
    %306 = arith.cmpi sgt, %c13_i32, %c0_i32_198 : i32
    %cst_199 = arith.constant 1.000000e+00 : f32
    %cst_200 = arith.constant 0.000000e+00 : f32
    %307 = arith.select %306, %cst_199, %cst_200 : f32
    %c15_i32_201 = arith.constant 15 : i32
    %308 = arith.cmpi slt, %c13_i32, %c15_i32_201 : i32
    %cst_202 = arith.constant 1.000000e+00 : f32
    %cst_203 = arith.constant 0.000000e+00 : f32
    %309 = arith.select %308, %cst_202, %cst_203 : f32
    %c1_i32_204 = arith.constant 1 : i32
    %310 = arith.subi %c13_i32, %c1_i32_204 : i32
    %c0_i32_205 = arith.constant 0 : i32
    %311 = arith.maxsi %310, %c0_i32_205 : i32
    %312 = arith.index_cast %311 : i32 to index
    %c0_206 = arith.constant 0 : index
    %313 = vector.load %arg1[%312, %c0_206] : memref<16x128xf32, #tpu.memory_space<vmem>>, vector<1x128xf32>
    %314 = vector.broadcast %307 : f32 to vector<1x128xf32>
    %315 = arith.mulf %313, %314 : vector<1x128xf32>
    %316 = arith.index_cast %c13_i32 : i32 to index
    %c0_207 = arith.constant 0 : index
    %317 = vector.load %arg1[%316, %c0_207] : memref<16x128xf32, #tpu.memory_space<vmem>>, vector<1x128xf32>
    %c1_i32_208 = arith.constant 1 : i32
    %318 = arith.addi %c13_i32, %c1_i32_208 : i32
    %c15_i32_209 = arith.constant 15 : i32
    %319 = arith.minsi %318, %c15_i32_209 : i32
    %320 = arith.index_cast %319 : i32 to index
    %c0_210 = arith.constant 0 : index
    %321 = vector.load %arg1[%320, %c0_210] : memref<16x128xf32, #tpu.memory_space<vmem>>, vector<1x128xf32>
    %322 = vector.broadcast %309 : f32 to vector<1x128xf32>
    %323 = arith.mulf %321, %322 : vector<1x128xf32>
    %324 = tpu.concatenate %315, %317, %323, %3 in 0 : vector<1x128xf32>, vector<1x128xf32>, vector<1x128xf32>, vector<5x128xf32> -> vector<8x128xf32>
    %cst_211 = arith.constant dense<0.000000e+00> : vector<64x128xf32>
    %325 = tpu.matmul %0, %324, %cst_211 {dimension_numbers = #tpu.dot_dimension_numbers<[1], [0], [0], [1], [0, 0, 1, 1], [], []>} : vector<64x8xf32>, vector<8x128xf32>, vector<64x128xf32> -> vector<64x128xf32>
    %cst_212 = arith.constant 0.000000e+00 : f32
    %326 = vector.broadcast %cst_212 : f32 to vector<64x128xf32>
    %327 = arith.maximumf %325, %326 : vector<64x128xf32>
    %328 = arith.addf %305, %327 : vector<64x128xf32>
    %c14_i32 = arith.constant 14 : i32
    %c0_i32_213 = arith.constant 0 : i32
    %329 = arith.cmpi sgt, %c14_i32, %c0_i32_213 : i32
    %cst_214 = arith.constant 1.000000e+00 : f32
    %cst_215 = arith.constant 0.000000e+00 : f32
    %330 = arith.select %329, %cst_214, %cst_215 : f32
    %c15_i32_216 = arith.constant 15 : i32
    %331 = arith.cmpi slt, %c14_i32, %c15_i32_216 : i32
    %cst_217 = arith.constant 1.000000e+00 : f32
    %cst_218 = arith.constant 0.000000e+00 : f32
    %332 = arith.select %331, %cst_217, %cst_218 : f32
    %c1_i32_219 = arith.constant 1 : i32
    %333 = arith.subi %c14_i32, %c1_i32_219 : i32
    %c0_i32_220 = arith.constant 0 : i32
    %334 = arith.maxsi %333, %c0_i32_220 : i32
    %335 = arith.index_cast %334 : i32 to index
    %c0_221 = arith.constant 0 : index
    %336 = vector.load %arg1[%335, %c0_221] : memref<16x128xf32, #tpu.memory_space<vmem>>, vector<1x128xf32>
    %337 = vector.broadcast %330 : f32 to vector<1x128xf32>
    %338 = arith.mulf %336, %337 : vector<1x128xf32>
    %339 = arith.index_cast %c14_i32 : i32 to index
    %c0_222 = arith.constant 0 : index
    %340 = vector.load %arg1[%339, %c0_222] : memref<16x128xf32, #tpu.memory_space<vmem>>, vector<1x128xf32>
    %c1_i32_223 = arith.constant 1 : i32
    %341 = arith.addi %c14_i32, %c1_i32_223 : i32
    %c15_i32_224 = arith.constant 15 : i32
    %342 = arith.minsi %341, %c15_i32_224 : i32
    %343 = arith.index_cast %342 : i32 to index
    %c0_225 = arith.constant 0 : index
    %344 = vector.load %arg1[%343, %c0_225] : memref<16x128xf32, #tpu.memory_space<vmem>>, vector<1x128xf32>
    %345 = vector.broadcast %332 : f32 to vector<1x128xf32>
    %346 = arith.mulf %344, %345 : vector<1x128xf32>
    %347 = tpu.concatenate %338, %340, %346, %3 in 0 : vector<1x128xf32>, vector<1x128xf32>, vector<1x128xf32>, vector<5x128xf32> -> vector<8x128xf32>
    %cst_226 = arith.constant dense<0.000000e+00> : vector<64x128xf32>
    %348 = tpu.matmul %0, %347, %cst_226 {dimension_numbers = #tpu.dot_dimension_numbers<[1], [0], [0], [1], [0, 0, 1, 1], [], []>} : vector<64x8xf32>, vector<8x128xf32>, vector<64x128xf32> -> vector<64x128xf32>
    %cst_227 = arith.constant 0.000000e+00 : f32
    %349 = vector.broadcast %cst_227 : f32 to vector<64x128xf32>
    %350 = arith.maximumf %348, %349 : vector<64x128xf32>
    %351 = arith.addf %328, %350 : vector<64x128xf32>
    %c15_i32_228 = arith.constant 15 : i32
    %c0_i32_229 = arith.constant 0 : i32
    %352 = arith.cmpi sgt, %c15_i32_228, %c0_i32_229 : i32
    %cst_230 = arith.constant 1.000000e+00 : f32
    %cst_231 = arith.constant 0.000000e+00 : f32
    %353 = arith.select %352, %cst_230, %cst_231 : f32
    %c15_i32_232 = arith.constant 15 : i32
    %354 = arith.cmpi slt, %c15_i32_228, %c15_i32_232 : i32
    %cst_233 = arith.constant 1.000000e+00 : f32
    %cst_234 = arith.constant 0.000000e+00 : f32
    %355 = arith.select %354, %cst_233, %cst_234 : f32
    %c1_i32_235 = arith.constant 1 : i32
    %356 = arith.subi %c15_i32_228, %c1_i32_235 : i32
    %c0_i32_236 = arith.constant 0 : i32
    %357 = arith.maxsi %356, %c0_i32_236 : i32
    %358 = arith.index_cast %357 : i32 to index
    %c0_237 = arith.constant 0 : index
    %359 = vector.load %arg1[%358, %c0_237] : memref<16x128xf32, #tpu.memory_space<vmem>>, vector<1x128xf32>
    %360 = vector.broadcast %353 : f32 to vector<1x128xf32>
    %361 = arith.mulf %359, %360 : vector<1x128xf32>
    %362 = arith.index_cast %c15_i32_228 : i32 to index
    %c0_238 = arith.constant 0 : index
    %363 = vector.load %arg1[%362, %c0_238] : memref<16x128xf32, #tpu.memory_space<vmem>>, vector<1x128xf32>
    %c1_i32_239 = arith.constant 1 : i32
    %364 = arith.addi %c15_i32_228, %c1_i32_239 : i32
    %c15_i32_240 = arith.constant 15 : i32
    %365 = arith.minsi %364, %c15_i32_240 : i32
    %366 = arith.index_cast %365 : i32 to index
    %c0_241 = arith.constant 0 : index
    %367 = vector.load %arg1[%366, %c0_241] : memref<16x128xf32, #tpu.memory_space<vmem>>, vector<1x128xf32>
    %368 = vector.broadcast %355 : f32 to vector<1x128xf32>
    %369 = arith.mulf %367, %368 : vector<1x128xf32>
    %370 = tpu.concatenate %361, %363, %369, %3 in 0 : vector<1x128xf32>, vector<1x128xf32>, vector<1x128xf32>, vector<5x128xf32> -> vector<8x128xf32>
    %cst_242 = arith.constant dense<0.000000e+00> : vector<64x128xf32>
    %371 = tpu.matmul %0, %370, %cst_242 {dimension_numbers = #tpu.dot_dimension_numbers<[1], [0], [0], [1], [0, 0, 1, 1], [], []>} : vector<64x8xf32>, vector<8x128xf32>, vector<64x128xf32> -> vector<64x128xf32>
    %cst_243 = arith.constant 0.000000e+00 : f32
    %372 = vector.broadcast %cst_243 : f32 to vector<64x128xf32>
    %373 = arith.maximumf %371, %372 : vector<64x128xf32>
    %374 = arith.addf %351, %373 : vector<64x128xf32>
    %c16_i32 = arith.constant 16 : i32
    %false = arith.constant false
    %cst_244 = arith.constant 1.000000e+00 : f32
    %cst_245 = arith.constant 0.000000e+00 : f32
    %375 = arith.select %false, %cst_244, %cst_245 : f32
    %true = arith.constant true
    %cst_246 = arith.constant 1.000000e+00 : f32
    %cst_247 = arith.constant 0.000000e+00 : f32
    %376 = arith.select %true, %cst_246, %cst_247 : f32
    %c-1_i32 = arith.constant -1 : i32
    %c0_i32_248 = arith.constant 0 : i32
    %377 = arith.maxsi %c-1_i32, %c0_i32_248 : i32
    %378 = arith.index_cast %377 : i32 to index
    %c0_249 = arith.constant 0 : index
    %379 = vector.load %arg1[%378, %c0_249] : memref<16x128xf32, #tpu.memory_space<vmem>>, vector<1x128xf32>
    %380 = vector.broadcast %375 : f32 to vector<1x128xf32>
    %381 = arith.mulf %379, %380 : vector<1x128xf32>
    %c0_250 = arith.constant 0 : index
    %c0_251 = arith.constant 0 : index
    %382 = vector.load %arg1[%c0_250, %c0_251] : memref<16x128xf32, #tpu.memory_space<vmem>>, vector<1x128xf32>
    %c1_i32_252 = arith.constant 1 : i32
    %c15_i32_253 = arith.constant 15 : i32
    %383 = arith.minsi %c1_i32_252, %c15_i32_253 : i32
    %384 = arith.index_cast %383 : i32 to index
    %c0_254 = arith.constant 0 : index
    %385 = vector.load %arg1[%384, %c0_254] : memref<16x128xf32, #tpu.memory_space<vmem>>, vector<1x128xf32>
    %386 = vector.broadcast %376 : f32 to vector<1x128xf32>
    %387 = arith.mulf %385, %386 : vector<1x128xf32>
    %388 = tpu.concatenate %381, %382, %387, %3 in 0 : vector<1x128xf32>, vector<1x128xf32>, vector<1x128xf32>, vector<5x128xf32> -> vector<8x128xf32>
    %cst_255 = arith.constant dense<0.000000e+00> : vector<64x128xf32>
    %389 = tpu.matmul %0, %388, %cst_255 {dimension_numbers = #tpu.dot_dimension_numbers<[1], [0], [0], [1], [0, 0, 1, 1], [], []>} : vector<64x8xf32>, vector<8x128xf32>, vector<64x128xf32> -> vector<64x128xf32>
    %cst_256 = arith.constant 0.000000e+00 : f32
    %390 = vector.broadcast %cst_256 : f32 to vector<64x128xf32>
    %391 = arith.maximumf %389, %390 : vector<64x128xf32>
    %true_257 = arith.constant true
    %cst_258 = arith.constant 1.000000e+00 : f32
    %cst_259 = arith.constant 0.000000e+00 : f32
    %392 = arith.select %true_257, %cst_258, %cst_259 : f32
    %false_260 = arith.constant false
    %cst_261 = arith.constant 1.000000e+00 : f32
    %cst_262 = arith.constant 0.000000e+00 : f32
    %393 = arith.select %false_260, %cst_261, %cst_262 : f32
    %c14_i32_263 = arith.constant 14 : i32
    %c0_i32_264 = arith.constant 0 : i32
    %394 = arith.maxsi %c14_i32_263, %c0_i32_264 : i32
    %395 = arith.index_cast %394 : i32 to index
    %c0_265 = arith.constant 0 : index
    %396 = vector.load %arg1[%395, %c0_265] : memref<16x128xf32, #tpu.memory_space<vmem>>, vector<1x128xf32>
    %397 = vector.broadcast %392 : f32 to vector<1x128xf32>
    %398 = arith.mulf %396, %397 : vector<1x128xf32>
    %c15 = arith.constant 15 : index
    %c0_266 = arith.constant 0 : index
    %399 = vector.load %arg1[%c15, %c0_266] : memref<16x128xf32, #tpu.memory_space<vmem>>, vector<1x128xf32>
    %c16_i32_267 = arith.constant 16 : i32
    %c15_i32_268 = arith.constant 15 : i32
    %400 = arith.minsi %c16_i32_267, %c15_i32_268 : i32
    %401 = arith.index_cast %400 : i32 to index
    %c0_269 = arith.constant 0 : index
    %402 = vector.load %arg1[%401, %c0_269] : memref<16x128xf32, #tpu.memory_space<vmem>>, vector<1x128xf32>
    %403 = vector.broadcast %393 : f32 to vector<1x128xf32>
    %404 = arith.mulf %402, %403 : vector<1x128xf32>
    %405 = tpu.concatenate %398, %399, %404, %3 in 0 : vector<1x128xf32>, vector<1x128xf32>, vector<1x128xf32>, vector<5x128xf32> -> vector<8x128xf32>
    %cst_270 = arith.constant dense<0.000000e+00> : vector<64x128xf32>
    %406 = tpu.matmul %0, %405, %cst_270 {dimension_numbers = #tpu.dot_dimension_numbers<[1], [0], [0], [1], [0, 0, 1, 1], [], []>} : vector<64x8xf32>, vector<8x128xf32>, vector<64x128xf32> -> vector<64x128xf32>
    %cst_271 = arith.constant 0.000000e+00 : f32
    %407 = vector.broadcast %cst_271 : f32 to vector<64x128xf32>
    %408 = arith.maximumf %406, %407 : vector<64x128xf32>
    %409 = arith.subf %374, %408 : vector<64x128xf32>
    %410 = arith.subf %374, %391 : vector<64x128xf32>
    %411 = tpu.concatenate %409, %374, %410, %5 in 0 : vector<64x128xf32>, vector<64x128xf32>, vector<64x128xf32>, vector<8x128xf32> -> vector<200x128xf32>
    %c0_272 = arith.constant 0 : index
    %c0_273 = arith.constant 0 : index
    %412 = vector.load %arg3[%c0_272, %c0_273] : memref<128x200xf32, #tpu.memory_space<vmem>>, vector<128x200xf32>
    %cst_274 = arith.constant dense<0.000000e+00> : vector<128x128xf32>
    %413 = tpu.matmul %412, %411, %cst_274 {dimension_numbers = #tpu.dot_dimension_numbers<[1], [0], [0], [1], [0, 0, 1, 1], [], []>} : vector<128x200xf32>, vector<200x128xf32>, vector<128x128xf32> -> vector<128x128xf32>
    %c0_275 = arith.constant 0 : index
    %c0_276 = arith.constant 0 : index
    %414 = vector.load %arg4[%c0_275, %c0_276] : memref<128x128xf32, #tpu.memory_space<vmem>>, vector<128x128xf32>
    tpu.vector_store %arg4[%c0_275, %c0_276], %413 {strides = array<i32>} : memref<128x128xf32, #tpu.memory_space<vmem>>, vector<128x128xf32>,
    return
  }
  func.func @transform_0(%arg0: i32) -> (i32, i32) {
    %c0_i32 = arith.constant 0 : i32
    %c0_i32_0 = arith.constant 0 : i32
    return %c0_i32, %arg0 : i32, i32
  }
  func.func @transform_1(%arg0: i32) -> (i32, i32) {
    %c0_i32 = arith.constant 0 : i32
    %c0_i32_0 = arith.constant 0 : i32
    %c0_i32_1 = arith.constant 0 : i32
    return %c0_i32, %c0_i32_0 : i32, i32
  }
  func.func @transform_2(%arg0: i32) -> (i32, i32) {
    %c0_i32 = arith.constant 0 : i32
    %c0_i32_0 = arith.constant 0 : i32
    %c0_i32_1 = arith.constant 0 : i32
    return %c0_i32, %c0_i32_0 : i32, i32
  }
  func.func @transform_3(%arg0: i32) -> (i32, i32) {
    %c0_i32 = arith.constant 0 : i32
    %c0_i32_0 = arith.constant 0 : i32
    return %c0_i32, %arg0 : i32, i32
  }
}

</mosaic_0001>

<bundles_post_ra>
// kernel: tpu_custom_call.1
= control target key start
LH: loop header
LB: loop body
LE: loop exit
PB: predicated region body
PF: predicated region fallthrough
CT: control target
= control target key end

     0   :  { %vm23_vm0 = vcmask 1040384   ;;  %v3965_v2 = vmov 0.0   ;;  %vm38_vm1 = vcmask 1041408   ;;  %vm40_vm2 = vcmask 1042432   ;;  %s3960_s0 = inlined_call_operand.vmem [shape: f32[16,128], index: 0, kind: input, shape index: {}]   ;;  %s3961_s1 = inlined_call_operand.vmem [shape: f32[64,8], index: 1, kind: input, shape index: {}]   ;;  %s3962_s2 = inlined_call_operand.vmem [shape: f32[128,200], index: 2, kind: input, shape index: {}]   ;;  %s3963_s3 = inlined_call_operand.hbm [shape: f32[128,128], index: 3, kind: output, shape index: {}]  }
   0x1   :  { %v25_v0 = vld [vmem:[%s3960_s0] sm:$0x1]  ;;  %v27_v1 = vld [vmem:[%s3960_s0 + $0x1] sm:$0x1]  ;;  %v24_v3 = vsel %vm23_vm0, 1.0, %v3965_v2  ;;  %vm42_vm3 = vcmask 64512  }
   0x2   :  { %v26_v4 = vmul.f32 0.0, %v25_v0  ;;  %v29_v5 = vrot.slane %v25_v0, 7  ;;  %v32_v6 = vrot.slane %v27_v1, 6  ;;  %v188_v7 = vld [vmem:[%s3960_s0 + $0x2] sm:$0x1]  ;;  %v3038_v8 = vrot.slane %v24_v3, 5 }
   0x3   :  { %v189_v9 = vrot.slane %v27_v1, 7  ;;  %v3043_v10 = vld [vmem:[%s3961_s1] sm:$0xff]  ;;  %v192_v12 = vrot.slane %v188_v7, 6  ;;  %v319_v14 = vrot.slane %v188_v7, 7  ;;  %v3064_v22 = vld [vmem:[%s3961_s1 + $0x8] sm:$0xff]  ;;  %v3087_v36 = vld [vmem:[%s3961_s1 + $0x10] sm:$0xff] }
   0x4   :  { %v37_v11 = vsel %vm23_vm0, %v26_v4, %v29_v5  ;;  %v318_v13 = vld [vmem:[%s3960_s0 + $0x3] sm:$0x1]  ;;  %2703 = vmatprep.mubr.msk.f32.mxu0 %vm42_vm3, %v3043_v10  ;;  %2717 = vmatprep.mubr.msk.f32.mxu1 %vm42_vm3, %v3043_v10  ;;  %v448_v18 = vld [vmem:[%s3960_s0 + $0x4] sm:$0x1]  ;;  %v578_v28 = vld [vmem:[%s3960_s0 + $0x5] sm:$0x1] }
   0x5   :  { %v39_v15 = vsel %vm38_vm1, %v37_v11, %v32_v6  ;;  %v194_v16 = vsel %vm23_vm0, %v25_v0, %v189_v9  ;;  %v322_v17 = vrot.slane %v318_v13, 6  ;;  %v449_v19 = vrot.slane %v318_v13, 7  ;;  %v708_v30 = vld [vmem:[%s3960_s0 + $0x6] sm:$0x1]  ;;  %v3095_v39 = vld [vmem:[%s3961_s1 + $0x18] sm:$0xff] }
   0x6   :  { %v41_v20 = vsel %vm40_vm2, %v39_v15, %v3038_v8  ;;  %v195_v21 = vsel %vm38_vm1, %v194_v16, %v192_v12  ;;  %v324_v23 = vsel %vm23_vm0, %v27_v1, %v319_v14  ;;  %v452_v24 = vrot.slane %v448_v18, 6  ;;  %v3102_v42 = vld [vmem:[%s3961_s1 + $0x20] sm:$0xff] }
   0x7   :  { %2701 = vmatprep.subr.mxu0 %v41_v20  ;;  %v196_v25 = vsel %vm40_vm2, %v195_v21, %v3038_v8  ;;  %v325_v26 = vsel %vm38_vm1, %v324_v23, %v322_v17  ;;  %v454_v27 = vsel %vm23_vm0, %v188_v7, %v449_v19  ;;  %v579_v29 = vrot.slane %v448_v18, 7  ;;  %v3114_v45 = vld [vmem:[%s3960_s0 + $0x7] sm:$0x1] }
   0x8   :  { %2715 = vmatprep.subr.mxu1 %v196_v25  ;;  %2702 = vmatpush3.msra.mxu0 %v41_v20  ;;  %v326_v31 = vsel %vm40_vm2, %v325_v26, %v3038_v8  ;;  %v455_v32 = vsel %vm38_vm1, %v454_v27, %v452_v24  ;;  %v582_v33 = vrot.slane %v578_v28, 6  ;;  %v709_v34 = vrot.slane %v578_v28, 7 }
   0x9   :  { %2716 = vmatpush3.msra.mxu1 %v196_v25  ;;  %2704 = vmatmul.mubr.msk.f32.vlgmr.msra.gmra.mxu0 %vm42_vm3, %v3064_v22  ;;  %v456_v35 = vsel %vm40_vm2, %v455_v32, %v3038_v8  ;;  %v584_v37 = vsel %vm23_vm0, %v318_v13, %v579_v29  ;;  %v712_v38 = vrot.slane %v708_v30, 6 }
   0xa   :  { %2718 = vmatmul.mubr.msk.f32.vlgmr.msra.gmra.mxu1 %vm42_vm3, %v3064_v22  ;;  %2729 = vmatprep.subr.mxu0 %v326_v31  ;;  %v585_v40 = vsel %vm38_vm1, %v584_v37, %v582_v33  ;;  %v714_v41 = vsel %vm23_vm0, %v448_v18, %v709_v34 }
   0xb   :  { %2730 = vmatpush3.msra.mxu0 %v326_v31  ;;  %2743 = vmatprep.subr.mxu1 %v456_v35  ;;  %v715_v43 = vsel %vm38_vm1, %v714_v41, %v712_v38  ;;  %v586_v44 = vsel %vm40_vm2, %v585_v40, %v3038_v8 }
   0xc   :  { %2706 = vmatprep.mubr.msk.f32.mxu0 %vm42_vm3, %v3087_v36  ;;  %2720 = vmatprep.mubr.msk.f32.mxu1 %vm42_vm3, %v3087_v36 }
   0xd   :  { %8 = vsyncpa [#allocation3], 0  ;;  %2744 = vmatpush3.msra.mxu1 %v456_v35  ;;  %2707 = vmatmul.mubr.msk.f32.gmra.mxu0 %vm42_vm3, %v3095_v39  ;;  %v716_v46 = vsel %vm40_vm2, %v715_v43, %v3038_v8  ;;  %v3127_v47 = vld [vmem:[%s3961_s1 + $0x28] sm:$0xff]  ;;  %v839_v48 = vrot.slane %v708_v30, 7  ;;  %v3134_v49 = vld [vmem:[%s3961_s1 + $0x30] sm:$0xff]  ;;  %v969_v51 = vrot.slane %v3114_v45, 7 }
   0xe   :  { %2721 = vmatmul.mubr.msk.f32.gmra.mxu1 %vm42_vm3, %v3095_v39  ;;  %2709 = vmatprep.mubr.msk.f32.mxu0 %vm42_vm3, %v3102_v42  ;;  %v3139_v50 = vld [vmem:[%s3960_s0 + $0x8] sm:$0x1]  ;;  %v1618_v52 = vld [vmem:[%s3960_s0 + $0xd] sm:$0x1]  ;;  %v3148_v53 = vld [vmem:[%s3960_s0 + $0xc] sm:$0x1] }
   0xf   :  { %2723 = vmatprep.mubr.msk.f32.mxu1 %vm42_vm3, %v3102_v42  ;;  %2757 = vmatprep.subr.mxu0 %v586_v44  ;;  %v1748_v54 = vld [vmem:[%s3960_s0 + $0xe] sm:$0x1]  ;;  %v842_v55 = vrot.slane %v3114_v45, 6  ;;  %v1619_v56 = vrot.slane %v3148_v53, 7  ;;  %v1878_v57 = vld [vmem:[%s3960_s0 + $0xf] sm:$0x1]  ;;  %v844_v59 = vsel %vm23_vm0, %v578_v28, %v839_v48  ;;  %v974_v0 = vsel %vm23_vm0, %v708_v30, %v969_v51 }
  0x10   :  { %2771 = vmatprep.subr.mxu1 %v716_v46  ;;  %v3167_v58 = vld [vmem:[%s3961_s1 + $0x38] sm:$0xff]  ;;  %v972_v60 = vrot.slane %v3139_v50, 6  ;;  %v3174_v61 = vld [vmem:[%s3960_s0 + $0xb] sm:$0x1]  ;;  %v1622_v62 = vrot.slane %v1618_v52, 6  ;;  %v1749_v63 = vrot.slane %v1618_v52, 7 }
  0x11   :  { %2710 = vmatmul.mubr.msk.f32.gmra.mxu0 %vm42_vm3, %v3127_v47  ;;  %v1624_v1 = vsel %vm23_vm0, %v3174_v61, %v1619_v56  ;;  %v1752_v3 = vrot.slane %v1748_v54, 6  ;;  %v1879_v4 = vrot.slane %v1748_v54, 7  ;;  %v1882_v7 = vrot.slane %v1878_v57, 6  ;;  %v1098_v27 = vld [vmem:[%s3960_s0 + $0x9] sm:$0x1] }
  0x12   :  { %2724 = vmatmul.mubr.msk.f32.gmra.mxu1 %vm42_vm3, %v3127_v47  ;;  %2712 = vmatprep.mubr.msk.f32.mxu0 %vm42_vm3, %v3134_v49  ;;  %v1625_v5 = vsel %vm38_vm1, %v1624_v1, %v1622_v62  ;;  %v1754_v6 = vsel %vm23_vm0, %v3148_v53, %v1749_v63  ;;  %v2008_v9 = vmul.f32 0.0, %v1878_v57  ;;  %v2009_v14 = vrot.slane %v1878_v57, 7  ;;  %v1228_v29 = vld [vmem:[%s3960_s0 + $0xa] sm:$0x1] }
  0x13   :  { %2726 = vmatprep.mubr.msk.f32.mxu1 %vm42_vm3, %v3134_v49  ;;  %v3188_v11 = vsel %vm40_vm2, %v1625_v5, %v3038_v8  ;;  %v1755_v12 = vsel %vm38_vm1, %v1754_v6, %v1752_v3  ;;  %v1884_v13 = vsel %vm23_vm0, %v1618_v52, %v1879_v4  ;;  %v845_v15 = vsel %vm38_vm1, %v844_v59, %v842_v55 }
  0x14   :  { %v3199_v16 = vsel %vm40_vm2, %v1755_v12, %v3038_v8  ;;  %v1885_v17 = vsel %vm38_vm1, %v1884_v13, %v1882_v7  ;;  %v2012_v18 = vrot.slane %v2008_v9, 6  ;;  %v975_v19 = vsel %vm38_vm1, %v974_v0, %v972_v60 }
  0x15   :  { %2713 = vmatmul.mubr.msk.f32.gmra.mxu0 %vm42_vm3, %v3167_v58  ;;  %v3207_v20 = vsel %vm40_vm2, %v1885_v17, %v3038_v8  ;;  %v2014_v21 = vsel %vm23_vm0, %v1748_v54, %v2009_v14  ;;  %v846_v24 = vsel %vm40_vm2, %v845_v15, %v3038_v8  ;;  %v976_v26 = vsel %vm40_vm2, %v975_v19, %v3038_v8 }
  0x16   :  { %2727 = vmatmul.mubr.msk.f32.gmra.mxu1 %vm42_vm3, %v3167_v58  ;;  %2731 = vmatprep.mubr.msk.f32.mxu0 %vm42_vm3, %v3043_v10  ;;  %v2015_v23 = vsel %vm38_vm1, %v2014_v21, %v2012_v18  ;;  %v1099_v28 = vrot.slane %v3139_v50, 7  ;;  %v1229_v30 = vrot.slane %v1098_v27, 7  ;;  %v1102_v31 = vrot.slane %v1098_v27, 6 }
  0x17   :  { %2745 = vmatprep.mubr.msk.f32.mxu1 %vm42_vm3, %v3043_v10  ;;  %v3217_v25 = vsel %vm40_vm2, %v2015_v23, %v3038_v8  ;;  %v1232_v33 = vrot.slane %v1228_v29, 6  ;;  %v1359_v41 = vrot.slane %v1228_v29, 7  ;;  %v1489_v43 = vrot.slane %v3174_v61, 7 }
  0x18   :  { %v1104_v32 = vsel %vm23_vm0, %v3114_v45, %v1099_v28  ;;  %v1234_v34 = vsel %vm23_vm0, %v3139_v50, %v1229_v30  ;;  %vm2186_vm4 = vcmask 588800  }
  0x19   :  { %2732 = vmatmul.mubr.msk.f32.vlgmr.msra.gmra.mxu0 %vm42_vm3, %v3064_v22  ;;  %v1105_v35 = vsel %vm38_vm1, %v1104_v32, %v1102_v31  ;;  %v1235_v37 = vsel %vm38_vm1, %v1234_v34, %v1232_v33  ;;  %v1364_v45 = vsel %vm23_vm0, %v1098_v27, %v1359_v41  ;;  %v1494_v48 = vsel %vm23_vm0, %v1228_v29, %v1489_v43 }
  0x1a   :  { %2746 = vmatmul.mubr.msk.f32.vlgmr.msra.gmra.mxu1 %vm42_vm3, %v3064_v22  ;;  %2758 = vmatpush3.msra.mxu0 %v586_v44  ;;  %v1106_v38 = vsel %vm40_vm2, %v1105_v35, %v3038_v8  ;;  %v1236_v40 = vsel %vm40_vm2, %v1235_v37, %v3038_v8  ;;  %v1362_v44 = vrot.slane %v3174_v61, 6 }
  0x1b   :  { %2734 = vmatprep.mubr.msk.f32.mxu0 %vm42_vm3, %v3087_v36  ;;  %2772 = vmatpush3.msra.mxu1 %v716_v46  ;;  %v1492_v46 = vrot.slane %v3148_v53, 6 }
  0x1c   :  { %2748 = vmatprep.mubr.msk.f32.mxu1 %vm42_vm3, %v3087_v36  ;;  %2785 = vmatprep.subr.mxu0 %v846_v24  ;;  %v1365_v50 = vsel %vm38_vm1, %v1364_v45, %v1362_v44 }
  0x1d   :  { %2735 = vmatmul.mubr.msk.f32.gmra.mxu0 %vm42_vm3, %v3095_v39  ;;  %2799 = vmatprep.subr.mxu1 %v976_v26  ;;  %v1495_v51 = vsel %vm38_vm1, %v1494_v48, %v1492_v46  ;;  %v1366_v52 = vsel %vm40_vm2, %v1365_v50, %v3038_v8 }
  0x1e   :  { %2749 = vmatmul.mubr.msk.f32.gmra.mxu1 %vm42_vm3, %v3095_v39  ;;  %2737 = vmatprep.mubr.msk.f32.mxu0 %vm42_vm3, %v3102_v42  ;;  %v1496_v53 = vsel %vm40_vm2, %v1495_v51, %v3038_v8 }
  0x1f   :  { %2751 = vmatprep.mubr.msk.f32.mxu1 %vm42_vm3, %v3102_v42 }
  0x21   :  { %2738 = vmatmul.mubr.msk.f32.gmra.mxu0 %vm42_vm3, %v3127_v47 }
  0x22   :  { %2752 = vmatmul.mubr.msk.f32.gmra.mxu1 %vm42_vm3, %v3127_v47  ;;  %2740 = vmatprep.mubr.msk.f32.mxu0 %vm42_vm3, %v3134_v49 }
  0x23   :  { %2754 = vmatprep.mubr.msk.f32.mxu1 %vm42_vm3, %v3134_v49 }
  0x25   :  { %2741 = vmatmul.mubr.msk.f32.gmra.mxu0 %vm42_vm3, %v3167_v58 }
  0x26   :  { %2755 = vmatmul.mubr.msk.f32.gmra.mxu1 %vm42_vm3, %v3167_v58  ;;  %2759 = vmatprep.mubr.msk.f32.mxu0 %vm42_vm3, %v3043_v10 }
  0x27   :  { %2773 = vmatprep.mubr.msk.f32.mxu1 %vm42_vm3, %v3043_v10 }
  0x29   :  { %2760 = vmatmul.mubr.msk.f32.vlgmr.msra.gmra.mxu0 %vm42_vm3, %v3064_v22 }
  0x2a   :  { %2774 = vmatmul.mubr.msk.f32.vlgmr.msra.gmra.mxu1 %vm42_vm3, %v3064_v22  ;;  %2786 = vmatpush3.msra.mxu0 %v846_v24 }
  0x2b   :  { %2762 = vmatprep.mubr.msk.f32.mxu0 %vm42_vm3, %v3087_v36  ;;  %2800 = vmatpush3.msra.mxu1 %v976_v26 }
  0x2c   :  { %2776 = vmatprep.mubr.msk.f32.mxu1 %vm42_vm3, %v3087_v36  ;;  %2813 = vmatprep.subr.mxu0 %v1106_v38 }
  0x2d   :  { %2763 = vmatmul.mubr.msk.f32.gmra.mxu0 %vm42_vm3, %v3095_v39  ;;  %2827 = vmatprep.subr.mxu1 %v1236_v40 }
  0x2e   :  { %2777 = vmatmul.mubr.msk.f32.gmra.mxu1 %vm42_vm3, %v3095_v39  ;;  %2765 = vmatprep.mubr.msk.f32.mxu0 %vm42_vm3, %v3102_v42 }
  0x2f   :  { %2779 = vmatprep.mubr.msk.f32.mxu1 %vm42_vm3, %v3102_v42 }
  0x31   :  { %2766 = vmatmul.mubr.msk.f32.gmra.mxu0 %vm42_vm3, %v3127_v47 }
  0x32   :  { %2780 = vmatmul.mubr.msk.f32.gmra.mxu1 %vm42_vm3, %v3127_v47  ;;  %2768 = vmatprep.mubr.msk.f32.mxu0 %vm42_vm3, %v3134_v49 }
  0x33   :  { %2782 = vmatprep.mubr.msk.f32.mxu1 %vm42_vm3, %v3134_v49 }
  0x35   :  { %2769 = vmatmul.mubr.msk.f32.gmra.mxu0 %vm42_vm3, %v3167_v58 }
  0x36   :  { %2783 = vmatmul.mubr.msk.f32.gmra.mxu1 %vm42_vm3, %v3167_v58  ;;  %2787 = vmatprep.mubr.msk.f32.mxu0 %vm42_vm3, %v3043_v10 }
  0x37   :  { %2801 = vmatprep.mubr.msk.f32.mxu1 %vm42_vm3, %v3043_v10 }
  0x39   :  { %2788 = vmatmul.mubr.msk.f32.vlgmr.msra.gmra.mxu0 %vm42_vm3, %v3064_v22 }
  0x3a   :  { %2802 = vmatmul.mubr.msk.f32.vlgmr.msra.gmra.mxu1 %vm42_vm3, %v3064_v22  ;;  %2814 = vmatpush3.msra.mxu0 %v1106_v38 }
  0x3b   :  { %2790 = vmatprep.mubr.msk.f32.mxu0 %vm42_vm3, %v3087_v36  ;;  %2828 = vmatpush3.msra.mxu1 %v1236_v40 }
  0x3c   :  { %2804 = vmatprep.mubr.msk.f32.mxu1 %vm42_vm3, %v3087_v36  ;;  %2841 = vmatprep.subr.mxu0 %v1366_v52 }
  0x3d   :  { %2791 = vmatmul.mubr.msk.f32.gmra.mxu0 %vm42_vm3, %v3095_v39  ;;  %2855 = vmatprep.subr.mxu1 %v1496_v53 }
  0x3e   :  { %2805 = vmatmul.mubr.msk.f32.gmra.mxu1 %vm42_vm3, %v3095_v39  ;;  %2793 = vmatprep.mubr.msk.f32.mxu0 %vm42_vm3, %v3102_v42 }
  0x3f   :  { %2807 = vmatprep.mubr.msk.f32.mxu1 %vm42_vm3, %v3102_v42 }
  0x41   :  { %2794 = vmatmul.mubr.msk.f32.gmra.mxu0 %vm42_vm3, %v3127_v47 }
  0x42   :  { %2808 = vmatmul.mubr.msk.f32.gmra.mxu1 %vm42_vm3, %v3127_v47  ;;  %2796 = vmatprep.mubr.msk.f32.mxu0 %vm42_vm3, %v3134_v49 }
  0x43   :  { %2810 = vmatprep.mubr.msk.f32.mxu1 %vm42_vm3, %v3134_v49 }
  0x45   :  { %2797 = vmatmul.mubr.msk.f32.gmra.mxu0 %vm42_vm3, %v3167_v58 }
  0x46   :  { %2811 = vmatmul.mubr.msk.f32.gmra.mxu1 %vm42_vm3, %v3167_v58  ;;  %2815 = vmatprep.mubr.msk.f32.mxu0 %vm42_vm3, %v3043_v10 }
  0x47   :  { %2829 = vmatprep.mubr.msk.f32.mxu1 %vm42_vm3, %v3043_v10 }
  0x49   :  { %2816 = vmatmul.mubr.msk.f32.vlgmr.msra.gmra.mxu0 %vm42_vm3, %v3064_v22 }
  0x4a   :  { %2830 = vmatmul.mubr.msk.f32.vlgmr.msra.gmra.mxu1 %vm42_vm3, %v3064_v22  ;;  %2842 = vmatpush3.msra.mxu0 %v1366_v52 }
  0x4b   :  { %2818 = vmatprep.mubr.msk.f32.mxu0 %vm42_vm3, %v3087_v36  ;;  %2856 = vmatpush3.msra.mxu1 %v1496_v53 }
  0x4c   :  { %2832 = vmatprep.mubr.msk.f32.mxu1 %vm42_vm3, %v3087_v36  ;;  %2869 = vmatprep.subr.mxu0 %v3188_v11 }
  0x4d   :  { %2819 = vmatmul.mubr.msk.f32.gmra.mxu0 %vm42_vm3, %v3095_v39  ;;  %2883 = vmatprep.subr.mxu1 %v3199_v16 }
  0x4e   :  { %2833 = vmatmul.mubr.msk.f32.gmra.mxu1 %vm42_vm3, %v3095_v39  ;;  %2821 = vmatprep.mubr.msk.f32.mxu0 %vm42_vm3, %v3102_v42 }
  0x4f   :  { %2835 = vmatprep.mubr.msk.f32.mxu1 %vm42_vm3, %v3102_v42 }
  0x51   :  { %2822 = vmatmul.mubr.msk.f32.gmra.mxu0 %vm42_vm3, %v3127_v47 }
  0x52   :  { %2836 = vmatmul.mubr.msk.f32.gmra.mxu1 %vm42_vm3, %v3127_v47  ;;  %2824 = vmatprep.mubr.msk.f32.mxu0 %vm42_vm3, %v3134_v49 }
  0x53   :  { %2838 = vmatprep.mubr.msk.f32.mxu1 %vm42_vm3, %v3134_v49 }
  0x55   :  { %2825 = vmatmul.mubr.msk.f32.gmra.mxu0 %vm42_vm3, %v3167_v58 }
  0x56   :  { %2839 = vmatmul.mubr.msk.f32.gmra.mxu1 %vm42_vm3, %v3167_v58  ;;  %2843 = vmatprep.mubr.msk.f32.mxu0 %vm42_vm3, %v3043_v10 }
  0x57   :  { %2857 = vmatprep.mubr.msk.f32.mxu1 %vm42_vm3, %v3043_v10 }
  0x59   :  { %2844 = vmatmul.mubr.msk.f32.vlgmr.msra.gmra.mxu0 %vm42_vm3, %v3064_v22 }
  0x5a   :  { %2858 = vmatmul.mubr.msk.f32.vlgmr.msra.gmra.mxu1 %vm42_vm3, %v3064_v22  ;;  %2870 = vmatpush3.msra.mxu0 %v3188_v11 }
  0x5b   :  { %2846 = vmatprep.mubr.msk.f32.mxu0 %vm42_vm3, %v3087_v36  ;;  %2884 = vmatpush3.msra.mxu1 %v3199_v16 }
  0x5c   :  { %2860 = vmatprep.mubr.msk.f32.mxu1 %vm42_vm3, %v3087_v36  ;;  %2897 = vmatprep.subr.mxu0 %v3207_v20 }
  0x5d   :  { %2847 = vmatmul.mubr.msk.f32.gmra.mxu0 %vm42_vm3, %v3095_v39  ;;  %2911 = vmatprep.subr.mxu1 %v3217_v25 }
  0x5e   :  { %2861 = vmatmul.mubr.msk.f32.gmra.mxu1 %vm42_vm3, %v3095_v39  ;;  %2849 = vmatprep.mubr.msk.f32.mxu0 %vm42_vm3, %v3102_v42 }
  0x5f   :  { %2863 = vmatprep.mubr.msk.f32.mxu1 %vm42_vm3, %v3102_v42 }
  0x61   :  { %2850 = vmatmul.mubr.msk.f32.gmra.mxu0 %vm42_vm3, %v3127_v47 }
  0x62   :  { %2864 = vmatmul.mubr.msk.f32.gmra.mxu1 %vm42_vm3, %v3127_v47  ;;  %2852 = vmatprep.mubr.msk.f32.mxu0 %vm42_vm3, %v3134_v49 }
  0x63   :  { %2866 = vmatprep.mubr.msk.f32.mxu1 %vm42_vm3, %v3134_v49 }
  0x65   :  { %2853 = vmatmul.mubr.msk.f32.gmra.mxu0 %vm42_vm3, %v3167_v58 }
  0x66   :  { %2867 = vmatmul.mubr.msk.f32.gmra.mxu1 %vm42_vm3, %v3167_v58  ;;  %2871 = vmatprep.mubr.msk.f32.mxu0 %vm42_vm3, %v3043_v10 }
  0x67   :  { %2885 = vmatprep.mubr.msk.f32.mxu1 %vm42_vm3, %v3043_v10 }
  0x69   :  { %2872 = vmatmul.mubr.msk.f32.vlgmr.msra.gmra.mxu0 %vm42_vm3, %v3064_v22 }
  0x6a   :  { %2886 = vmatmul.mubr.msk.f32.vlgmr.msra.gmra.mxu1 %vm42_vm3, %v3064_v22  ;;  %2898 = vmatpush3.msra.mxu0 %v3207_v20 }
  0x6b   :  { %2874 = vmatprep.mubr.msk.f32.mxu0 %vm42_vm3, %v3087_v36  ;;  %2912 = vmatpush3.msra.mxu1 %v3217_v25 }
  0x6c   :  { %2888 = vmatprep.mubr.msk.f32.mxu1 %vm42_vm3, %v3087_v36  ;;  %2235 = vmatprep.subr.mxu0 %v3965_v2 }
  0x6d   :  { %2875 = vmatmul.mubr.msk.f32.gmra.mxu0 %vm42_vm3, %v3095_v39  ;;  %2925 = vmatprep.subr.mxu1 %v3965_v2 }
  0x6e   :  { %2889 = vmatmul.mubr.msk.f32.gmra.mxu1 %vm42_vm3, %v3095_v39  ;;  %2877 = vmatprep.mubr.msk.f32.mxu0 %vm42_vm3, %v3102_v42 }
  0x6f   :  { %2891 = vmatprep.mubr.msk.f32.mxu1 %vm42_vm3, %v3102_v42 }
  0x71   :  { %2878 = vmatmul.mubr.msk.f32.gmra.mxu0 %vm42_vm3, %v3127_v47 }
  0x72   :  { %2892 = vmatmul.mubr.msk.f32.gmra.mxu1 %vm42_vm3, %v3127_v47  ;;  %2880 = vmatprep.mubr.msk.f32.mxu0 %vm42_vm3, %v3134_v49 }
  0x73   :  { %2894 = vmatprep.mubr.msk.f32.mxu1 %vm42_vm3, %v3134_v49 }
  0x75   :  { %2881 = vmatmul.mubr.msk.f32.gmra.mxu0 %vm42_vm3, %v3167_v58 }
  0x76   :  { %2895 = vmatmul.mubr.msk.f32.gmra.mxu1 %vm42_vm3, %v3167_v58  ;;  %2899 = vmatprep.mubr.msk.f32.mxu0 %vm42_vm3, %v3043_v10 }
  0x77   :  { %2913 = vmatprep.mubr.msk.f32.mxu1 %vm42_vm3, %v3043_v10 }
  0x79   :  { %2900 = vmatmul.mubr.msk.f32.vlgmr.msra.gmra.mxu0 %vm42_vm3, %v3064_v22 }
  0x7a   :  { %2914 = vmatmul.mubr.msk.f32.vlgmr.msra.gmra.mxu1 %vm42_vm3, %v3064_v22  ;;  %2902 = vmatprep.mubr.msk.f32.mxu0 %vm42_vm3, %v3087_v36 }
  0x7b   :  { %2916 = vmatprep.mubr.msk.f32.mxu1 %vm42_vm3, %v3087_v36 }
  0x7d   :  { %2903 = vmatmul.mubr.msk.f32.gmra.mxu0 %vm42_vm3, %v3095_v39 }
  0x7e   :  { %2917 = vmatmul.mubr.msk.f32.gmra.mxu1 %vm42_vm3, %v3095_v39  ;;  %2905 = vmatprep.mubr.msk.f32.mxu0 %vm42_vm3, %v3102_v42 }
  0x7f   :  { %2919 = vmatprep.mubr.msk.f32.mxu1 %vm42_vm3, %v3102_v42 }
  0x81   :  { %2906 = vmatmul.mubr.msk.f32.gmra.mxu0 %vm42_vm3, %v3127_v47 }
  0x82   :  { %2920 = vmatmul.mubr.msk.f32.gmra.mxu1 %vm42_vm3, %v3127_v47  ;;  %2908 = vmatprep.mubr.msk.f32.mxu0 %vm42_vm3, %v3134_v49 }
  0x83   :  { %2922 = vmatprep.mubr.msk.f32.mxu1 %vm42_vm3, %v3134_v49 }
  0x85   :  { %2909 = vmatmul.mubr.msk.f32.gmra.mxu0 %vm42_vm3, %v3167_v58 }
  0x86   :  { %2923 = vmatmul.mubr.msk.f32.gmra.mxu1 %vm42_vm3, %v3167_v58 }
  0xc9   :  { %v3477_v8 = vpop.f32.mrf.mxu0 }
  0xca   :  { %v3973_v10 = vmax.f32 %v3477_v8, 0.0  ;;  %v2719_v22 = vpop.f32.mrf.mxu1 }
  0xcb   :  { %v303_v36 = vmax.f32 %v2719_v22, 0.0  ;;  %v3480_v39 = vpop.f32.mrf.mxu0 }
  0xcc   :  { %v3972_v42 = vmax.f32 %v3480_v39, 0.0  ;;  %v263_v47 = vpop.f32.mrf.mxu1 }
  0xcd   :  { %v311_v49 = vadd.f32 %v303_v36, %v3973_v10  ;;  %v302_v54 = vmax.f32 %v263_v47, 0.0  ;;  %v3485_v55 = vpop.f32.mrf.mxu0 }
  0xce   :  { %v3971_v56 = vmax.f32 %v3485_v55, 0.0  ;;  %v2722_v57 = vpop.f32.mrf.mxu1 }
  0xcf   :  { %v310_v58 = vadd.f32 %v302_v54, %v3972_v42  ;;  %v305_v59 = vmax.f32 %v2722_v57, 0.0  ;;  %v3490_v60 = vpop.f32.mrf.mxu0 }
  0xd0   :  { %v3970_v61 = vmax.f32 %v3490_v60, 0.0  ;;  %v273_v62 = vpop.f32.mrf.mxu1 }
  0xd1   :  { %v313_v63 = vadd.f32 %v305_v59, %v3971_v56  ;;  %v304_v0 = vmax.f32 %v273_v62, 0.0  ;;  %v3495_v1 = vpop.f32.mrf.mxu0 }
  0xd2   :  { %v3969_v3 = vmax.f32 %v3495_v1, 0.0  ;;  %v2725_v4 = vpop.f32.mrf.mxu1 }
  0xd3   :  { %v312_v5 = vadd.f32 %v304_v0, %v3970_v61  ;;  %v307_v6 = vmax.f32 %v2725_v4, 0.0  ;;  %v3500_v7 = vpop.f32.mrf.mxu0 }
  0xd4   :  { %v3968_v9 = vmax.f32 %v3500_v7, 0.0  ;;  %v283_v11 = vpop.f32.mrf.mxu1 }
  0xd5   :  { %v315_v12 = vadd.f32 %v307_v6, %v3969_v3  ;;  %v306_v13 = vmax.f32 %v283_v11, 0.0  ;;  %v3505_v14 = vpop.f32.mrf.mxu0 }
  0xd6   :  { %v3967_v15 = vmax.f32 %v3505_v14, 0.0  ;;  %v2728_v16 = vpop.f32.mrf.mxu1 }
  0xd7   :  { %v314_v17 = vadd.f32 %v306_v13, %v3968_v9  ;;  %v309_v18 = vmax.f32 %v2728_v16, 0.0  ;;  %v3510_v19 = vpop.f32.mrf.mxu0 }
  0xd8   :  { %3975 = vst [vmem:[#allocation5_spill] sm:$0xff] %v3510_v19  ;;  %v3964_v20 = vmax.f32 %v3510_v19, 0.0  ;;  %v293_v21 = vpop.f32.mrf.mxu1 }
  0xd9   :  { %v317_v23 = vadd.f32 %v309_v18, %v3967_v15  ;;  %v308_v24 = vmax.f32 %v293_v21, 0.0  ;;  %v2733_v25 = vpop.f32.mrf.mxu0 }
  0xda   :  { %v433_v26 = vmax.f32 %v2733_v25, 0.0  ;;  %v2747_v27 = vpop.f32.mrf.mxu1 }
  0xdb   :  { %v316_v28 = vadd.f32 %v308_v24, %v3964_v20  ;;  %v563_v29 = vmax.f32 %v2747_v27, 0.0  ;;  %v393_v30 = vpop.f32.mrf.mxu0 }
  0xdc   :  { %v441_v31 = vadd.f32 %v433_v26, %v311_v49  ;;  %v432_v32 = vmax.f32 %v393_v30, 0.0  ;;  %v523_v33 = vpop.f32.mrf.mxu1 }
  0xdd   :  { %v2736_v34 = vpop.f32.mrf.mxu0  ;;  %v562_v38 = vmax.f32 %v523_v33, 0.0 }
  0xde   :  { %v571_v35 = vadd.f32 %v563_v29, %v441_v31  ;;  %v440_v37 = vadd.f32 %v432_v32, %v310_v58  ;;  %v435_v40 = vmax.f32 %v2736_v34, 0.0  ;;  %v2750_v41 = vpop.f32.mrf.mxu1 }
  0xdf   :  { %v565_v43 = vmax.f32 %v2750_v41, 0.0  ;;  %v403_v44 = vpop.f32.mrf.mxu0 }
  0xe0   :  { %v570_v45 = vadd.f32 %v562_v38, %v440_v37  ;;  %v443_v46 = vadd.f32 %v435_v40, %v313_v63  ;;  %v434_v48 = vmax.f32 %v403_v44, 0.0  ;;  %v533_v50 = vpop.f32.mrf.mxu1 }
  0xe1   :  { %v2739_v51 = vpop.f32.mrf.mxu0  ;;  %v564_v22 = vmax.f32 %v533_v50, 0.0 }
  0xe2   :  { %v573_v52 = vadd.f32 %v565_v43, %v443_v46  ;;  %v442_v53 = vadd.f32 %v434_v48, %v312_v5  ;;  %v437_v36 = vmax.f32 %v2739_v51, 0.0  ;;  %v2753_v47 = vpop.f32.mrf.mxu1 }
  0xe3   :  { %v567_v49 = vmax.f32 %v2753_v47, 0.0  ;;  %v413_v54 = vpop.f32.mrf.mxu0 }
  0xe4   :  { %v572_v57 = vadd.f32 %v564_v22, %v442_v53  ;;  %v445_v59 = vadd.f32 %v437_v36, %v315_v12  ;;  %v436_v58 = vmax.f32 %v413_v54, 0.0  ;;  %v543_v62 = vpop.f32.mrf.mxu1 }
  0xe5   :  { %v2742_v0 = vpop.f32.mrf.mxu0  ;;  %v566_v11 = vmax.f32 %v543_v62, 0.0 }
  0xe6   :  { %v575_v4 = vadd.f32 %v567_v49, %v445_v59  ;;  %v444_v6 = vadd.f32 %v436_v58, %v314_v17  ;;  %v439_v13 = vmax.f32 %v2742_v0, 0.0  ;;  %v2756_v63 = vpop.f32.mrf.mxu1 }
  0xe7   :  { %v569_v16 = vmax.f32 %v2756_v63, 0.0  ;;  %v423_v18 = vpop.f32.mrf.mxu0 }
  0xe8   :  { %v574_v21 = vadd.f32 %v566_v11, %v444_v6  ;;  %v447_v24 = vadd.f32 %v439_v13, %v317_v23  ;;  %v438_v5 = vmax.f32 %v423_v18, 0.0  ;;  %v553_v25 = vpop.f32.mrf.mxu1 }
  0xe9   :  { %v2761_v26 = vpop.f32.mrf.mxu0  ;;  %v568_v30 = vmax.f32 %v553_v25, 0.0 }
  0xea   :  { %v3517_v27 = vadd.f32 %v569_v16, %v447_v24  ;;  %v446_v29 = vadd.f32 %v438_v5, %v316_v28  ;;  %v693_v12 = vmax.f32 %v2761_v26, 0.0  ;;  %v2775_v31 = vpop.f32.mrf.mxu1 }
  0xeb   :  { %v823_v32 = vmax.f32 %v2775_v31, 0.0  ;;  %v653_v33 = vpop.f32.mrf.mxu0 }
  0xec   :  { %v3519_v34 = vadd.f32 %v568_v30, %v446_v29  ;;  %v701_v17 = vadd.f32 %v693_v12, %v571_v35  ;;  %v692_v37 = vmax.f32 %v653_v33, 0.0  ;;  %v783_v38 = vpop.f32.mrf.mxu1  ;;  %v2171_v33 = vld [vmem:[%s3962_s2 + $0x88] sm:$0xff] }
  0xed   :  { %v2764_v40 = vpop.f32.mrf.mxu0  ;;  %v822_v23 = vmax.f32 %v783_v38, 0.0  ;;  %2549 = vmatprep.mubr.msk.f32.mxu1 %vm2186_vm4, %v2171_v33 }
  0xee   :  { %v831_v41 = vadd.f32 %v823_v32, %v701_v17  ;;  %v700_v43 = vadd.f32 %v692_v37, %v570_v45  ;;  %v695_v44 = vmax.f32 %v2764_v40, 0.0  ;;  %v2778_v46 = vpop.f32.mrf.mxu1 }
  0xef   :  { %v825_v48 = vmax.f32 %v2778_v46, 0.0  ;;  %v663_v50 = vpop.f32.mrf.mxu0 }
  0xf0   :  { %v830_v51 = vadd.f32 %v822_v23, %v700_v43  ;;  %v703_v28 = vadd.f32 %v695_v44, %v573_v52  ;;  %v694_v53 = vmax.f32 %v663_v50, 0.0  ;;  %v793_v22 = vpop.f32.mrf.mxu1 }
  0xf1   :  { %v2767_v36 = vpop.f32.mrf.mxu0  ;;  %v824_v54 = vmax.f32 %v793_v22, 0.0 }
  0xf2   :  { %v833_v47 = vadd.f32 %v825_v48, %v703_v28  ;;  %v702_v49 = vadd.f32 %v694_v53, %v572_v57  ;;  %v697_v59 = vmax.f32 %v2767_v36, 0.0  ;;  %v2781_v35 = vpop.f32.mrf.mxu1 }
  0xf3   :  { %v827_v58 = vmax.f32 %v2781_v35, 0.0  ;;  %v673_v62 = vpop.f32.mrf.mxu0 }
  0xf4   :  { %v832_v0 = vadd.f32 %v824_v54, %v702_v49  ;;  %v705_v6 = vadd.f32 %v697_v59, %v575_v4  ;;  %v696_v45 = vmax.f32 %v673_v62, 0.0  ;;  %v803_v11 = vpop.f32.mrf.mxu1 }
  0xf5   :  { %v3521_v13 = vpop.f32.mrf.mxu0  ;;  %v826_v52 = vmax.f32 %v803_v11, 0.0 }
  0xf6   :  { %v3523_v63 = vadd.f32 %v827_v58, %v705_v6  ;;  %v704_v16 = vadd.f32 %v696_v45, %v574_v21  ;;  %v3525_v18 = vpop.f32.mrf.mxu1  ;;  %v2155_v21 = vld [vmem:[%s3962_s2 + $0x8] sm:$0xff] }
  0xf7   :  { %v3527_v24 = vpop.f32.mrf.mxu0  ;;  %2541 = vmatprep.mubr.msk.f32.mxu0 %vm2186_vm4, %v2155_v21 }
  0xf8   :  { %v3529_v57 = vadd.f32 %v826_v52, %v704_v16  ;;  %v3531_v5 = vpop.f32.mrf.mxu1 }
  0xf9   :  { %v2789_v25 = vpop.f32.mrf.mxu0  ;;  %v828_v61 = vmax.f32 %v3531_v5, 0.0 }
  0xfa   :  { %v953_v26 = vmax.f32 %v2789_v25, 0.0  ;;  %v2803_v29 = vpop.f32.mrf.mxu1 }
  0xfb   :  { %v1083_v4 = vmax.f32 %v2803_v29, 0.0  ;;  %v913_v30 = vpop.f32.mrf.mxu0 }
  0xfc   :  { %v961_v12 = vadd.f32 %v953_v26, %v831_v41  ;;  %v952_v31 = vmax.f32 %v913_v30, 0.0  ;;  %v1043_v32 = vpop.f32.mrf.mxu1 }
  0xfd   :  { %v2792_v17 = vpop.f32.mrf.mxu0  ;;  %v1082_v40 = vmax.f32 %v1043_v32, 0.0 }
  0xfe   :  { %v3541_v37 = vadd.f32 %v1083_v4, %v961_v12  ;;  %v960_v38 = vadd.f32 %v952_v31, %v830_v51  ;;  %v955_v41 = vmax.f32 %v2792_v17, 0.0  ;;  %v2806_v43 = vpop.f32.mrf.mxu1 }
  0xff   :  { %v1085_v23 = vmax.f32 %v2806_v43, 0.0  ;;  %v923_v44 = vpop.f32.mrf.mxu0  ;;  %v699_v43 = vmax.f32 %v3521_v13, 0.0 }
 0x100   :  { %v3543_v46 = vadd.f32 %v1082_v40, %v960_v38  ;;  %v963_v48 = vadd.f32 %v955_v41, %v833_v47  ;;  %v954_v50 = vmax.f32 %v923_v44, 0.0  ;;  %v1053_v28 = vpop.f32.mrf.mxu1  ;;  %v698_v44 = vmax.f32 %v3527_v24, 0.0 }
 0x101   :  { %v2795_v53 = vpop.f32.mrf.mxu0  ;;  %v1084_v49 = vmax.f32 %v1053_v28, 0.0 }
 0x102   :  { %v3545_v22 = vadd.f32 %v1085_v23, %v963_v48  ;;  %v962_v36 = vadd.f32 %v954_v50, %v832_v0  ;;  %v3547_v54 = vpop.f32.mrf.mxu1  ;;  %v957_v20 = vmax.f32 %v2795_v53, 0.0  ;;  %v706_v15 = vadd.f32 %v698_v44, %v3519_v34 }
 0x103   :  { %v933_v59 = vpop.f32.mrf.mxu0  ;;  %v1087_v53 = vmax.f32 %v3547_v54, 0.0 }
 0x104   :  { %v3549_v35 = vadd.f32 %v1084_v49, %v962_v36  ;;  %v3551_v51 = vpop.f32.mrf.mxu1  ;;  %v707_v36 = vadd.f32 %v699_v43, %v3517_v27  ;;  %v829_v49 = vmax.f32 %v3525_v18, 0.0  ;;  %v956_v9 = vmax.f32 %v933_v59, 0.0 }
 0x105   :  { %v2798_v58 = vpop.f32.mrf.mxu0  ;;  %v965_v18 = vadd.f32 %v957_v20, %v3523_v63  ;;  %v836_v34 = vadd.f32 %v828_v61, %v706_v15  ;;  %v1086_v59 = vmax.f32 %v3551_v51, 0.0 }
 0x106   :  { %v3553_v62 = vpop.f32.mrf.mxu1  ;;  %v959_v3 = vmax.f32 %v2798_v58, 0.0  ;;  %v837_v27 = vadd.f32 %v829_v49, %v707_v36  ;;  %v964_v44 = vadd.f32 %v956_v9, %v3529_v57 }
 0x107   :  { %v943_v6 = vpop.f32.mrf.mxu0  ;;  %v1095_v54 = vadd.f32 %v1087_v53, %v965_v18 }
 0x108   :  { %v3555_v45 = vpop.f32.mrf.mxu1  ;;  %v958_v56 = vmax.f32 %v943_v6, 0.0  ;;  %v967_v5 = vadd.f32 %v959_v3, %v837_v27  ;;  %v1089_v6 = vmax.f32 %v3553_v62, 0.0 }
 0x109   :  { %v2817_v47 = vpop.f32.mrf.mxu0  ;;  %v1088_v62 = vmax.f32 %v3555_v45, 0.0 }
 0x10a   :  { %v3557_v11 = vpop.f32.mrf.mxu1  ;;  %v1213_v42 = vmax.f32 %v2817_v47, 0.0  ;;  %v966_v36 = vadd.f32 %v958_v56, %v836_v34 }
 0x10b   :  { %v1173_v16 = vpop.f32.mrf.mxu0  ;;  %v1343_v63 = vmax.f32 %v3557_v11, 0.0 }
 0x10c   :  { %v3559_v52 = vpop.f32.mrf.mxu1  ;;  %v1212_v10 = vmax.f32 %v1173_v16, 0.0  ;;  %v1221_v20 = vadd.f32 %v1213_v42, %v3541_v37  ;;  %v1096_v49 = vadd.f32 %v1088_v62, %v966_v36 }
 0x10d   :  { %v3561_v0 = vpop.f32.mrf.mxu0  ;;  %v1342_v56 = vmax.f32 %v3559_v52, 0.0 }
 0x10e   :  { %v3563_v25 = vpop.f32.mrf.mxu1  ;;  %v1215_v47 = vmax.f32 %v3561_v0, 0.0  ;;  %v1220_v61 = vadd.f32 %v1212_v10, %v3543_v46  ;;  %v1094_v46 = vadd.f32 %v1086_v59, %v964_v44  ;;  %v1351_v45 = vadd.f32 %v1343_v63, %v1221_v20 }
 0x10f   :  { %v3565_v26 = vpop.f32.mrf.mxu0  ;;  %v1345_v0 = vmax.f32 %v3563_v25, 0.0 }
 0x110   :  { %v3567_v29 = vpop.f32.mrf.mxu1  ;;  %v1214_v51 = vmax.f32 %v3565_v26, 0.0  ;;  %v1223_v11 = vadd.f32 %v1215_v47, %v3545_v22  ;;  %v1350_v27 = vadd.f32 %v1342_v56, %v1220_v61 }
 0x111   :  { %v3569_v4 = vpop.f32.mrf.mxu0 }
 0x112   :  { %v3571_v30 = vpop.f32.mrf.mxu1  ;;  %v1217_v3 = vmax.f32 %v3569_v4, 0.0 }
 0x113   :  { %v3573_v12 = vpop.f32.mrf.mxu0  ;;  %v1347_v18 = vmax.f32 %v3571_v30, 0.0 }
 0x114   :  { %v3575_v31 = vpop.f32.mrf.mxu1  ;;  %v1216_v9 = vmax.f32 %v3573_v12, 0.0  ;;  %v1097_v12 = vadd.f32 %v1089_v6, %v967_v5  ;;  %v1353_v5 = vadd.f32 %v1345_v0, %v1223_v11  ;;  %v1344_v6 = vmax.f32 %v3567_v29, 0.0 }
 0x115   :  { %v3577_v32 = vpop.f32.mrf.mxu0  ;;  %v1346_v30 = vmax.f32 %v3575_v31, 0.0 }
 0x116   :  { %v3579_v21 = vpop.f32.mrf.mxu1  ;;  %v1219_v42 = vmax.f32 %v3577_v32, 0.0  ;;  %v1222_v32 = vadd.f32 %v1214_v51, %v3549_v35  ;;  %v1224_v53 = vadd.f32 %v1216_v9, %v1094_v46 }
 0x117   :  { %v3581_v33 = vpop.f32.mrf.mxu0  ;;  %v1349_v25 = vmax.f32 %v3579_v21, 0.0 }
 0x118   :  { %v3583_v17 = vpop.f32.mrf.mxu1  ;;  %v1218_v37 = vmax.f32 %v3581_v33, 0.0  ;;  %v1225_v33 = vadd.f32 %v1217_v3, %v1095_v54  ;;  %v1227_v22 = vadd.f32 %v1219_v42, %v1097_v12  ;;  %v1352_v54 = vadd.f32 %v1344_v6, %v1222_v32 }
 0x119   :  { %v3585_v38 = vpop.f32.mrf.mxu0  ;;  %v1348_v20 = vmax.f32 %v3583_v17, 0.0 }
 0x11a   :  { %v3587_v40 = vpop.f32.mrf.mxu1  ;;  %v1473_v26 = vmax.f32 %v3585_v38, 0.0  ;;  %v1226_v38 = vadd.f32 %v1218_v37, %v1096_v49  ;;  %v1357_v9 = vadd.f32 %v1349_v25, %v1227_v22 }
 0x11b   :  { %v3589_v41 = vpop.f32.mrf.mxu0  ;;  %v1603_v36 = vmax.f32 %v3587_v40, 0.0  ;;  %v1354_v40 = vadd.f32 %v1346_v30, %v1224_v53 }
 0x11c   :  { %v3592_v23 = vpop.f32.mrf.mxu1  ;;  %v1472_v59 = vmax.f32 %v3589_v41, 0.0  ;;  %v1481_v47 = vadd.f32 %v1473_v26, %v1351_v45  ;;  %v1355_v41 = vadd.f32 %v1347_v18, %v1225_v33  ;;  %v1356_v62 = vadd.f32 %v1348_v20, %v1226_v38 }
 0x11d   :  { %v3595_v48 = vpop.f32.mrf.mxu0  ;;  %v1602_v17 = vmax.f32 %v3592_v23, 0.0 }
 0x11e   :  { %v3597_v50 = vpop.f32.mrf.mxu1  ;;  %v1475_v63 = vmax.f32 %v3595_v48, 0.0  ;;  %v1480_v56 = vadd.f32 %v1472_v59, %v1350_v27  ;;  %v1611_v42 = vadd.f32 %v1603_v36, %v1481_v47 }
 0x11f   :  { %v3599_v28 = vpop.f32.mrf.mxu0 }
 0x120   :  { %v3603_v2 = vpop.f32.mrf.mxu1  ;;  %v1474_v21 = vmax.f32 %v3599_v28, 0.0  ;;  %v1483_v46 = vadd.f32 %v1475_v63, %v1353_v5 }
 0x121   :  { %v3606_v13 = vpop.f32.mrf.mxu0 }
 0x122   :  { %v3608_v24 = vpop.f32.mrf.mxu1  ;;  %v1477_v51 = vmax.f32 %v3606_v13, 0.0  ;;  %v1605_v13 = vmax.f32 %v3597_v50, 0.0 }
 0x123   :  { %v3611_v19 = vpop.f32.mrf.mxu0  ;;  %v1607_v12 = vmax.f32 %v3608_v24, 0.0 }
 0x124   :  { %v3615_v43 = vpop.f32.mrf.mxu1  ;;  %v1476_v29 = vmax.f32 %v3611_v19, 0.0  ;;  %v1482_v19 = vadd.f32 %v1474_v21, %v1352_v54  ;;  %v1485_v26 = vadd.f32 %v1477_v51, %v1355_v41  ;;  %v1613_v24 = vadd.f32 %v1605_v13, %v1483_v46 }
 0x125   :  { %v3618_v58 = vpop.f32.mrf.mxu0  ;;  %v1606_v27 = vmax.f32 %v3615_v43, 0.0 }
 0x126   :  { %v3623_v16 = vpop.f32.mrf.mxu1  ;;  %v1479_v48 = vmax.f32 %v3618_v58, 0.0  ;;  %v1484_v49 = vadd.f32 %v1476_v29, %v1354_v40  ;;  %v1610_v58 = vadd.f32 %v1602_v17, %v1480_v56  ;;  %v1615_v5 = vadd.f32 %v1607_v12, %v1485_v26 }
 0x127   :  { %v3628_v15 = vpop.f32.mrf.mxu0  ;;  %v1609_v18 = vmax.f32 %v3623_v16, 0.0 }
 0x128   :  { %v3633_v57 = vpop.f32.mrf.mxu1  ;;  %v1478_v11 = vmax.f32 %v3628_v15, 0.0  ;;  %v1487_v50 = vadd.f32 %v1479_v48, %v1357_v9  ;;  %v1614_v6 = vadd.f32 %v1606_v27, %v1484_v49 }
 0x129   :  { %v3639_v10 = vpop.f32.mrf.mxu0  ;;  %v1608_v43 = vmax.f32 %v3633_v57, 0.0 }
 0x12a   :  { %v3644_v4 = vpop.f32.mrf.mxu1  ;;  %v1733_v28 = vmax.f32 %v3639_v10, 0.0  ;;  %v1604_v10 = vmax.f32 %v3603_v2, 0.0  ;;  %v1486_v25 = vadd.f32 %v1478_v11, %v1356_v62 }
 0x12b   :  { %v3646_v52 = vpop.f32.mrf.mxu0  ;;  %v1863_v53 = vmax.f32 %v3644_v4, 0.0  ;;  %v1617_v4 = vadd.f32 %v1609_v18, %v1487_v50 }
 0x12c   :  { %v3650_v34 = vpop.f32.mrf.mxu1  ;;  %v1732_v45 = vmax.f32 %v3646_v52, 0.0  ;;  %v1741_v15 = vadd.f32 %v1733_v28, %v1611_v42  ;;  %v1612_v59 = vadd.f32 %v1604_v10, %v1482_v19  ;;  %v1616_v54 = vadd.f32 %v1608_v43, %v1486_v25 }
 0x12d   :  { %v2876_v44 = vpop.f32.mrf.mxu0  ;;  %v1862_v63 = vmax.f32 %v3650_v34, 0.0 }
 0x12e   :  { %v3656_v35 = vpop.f32.mrf.mxu1  ;;  %v1735_v32 = vmax.f32 %v2876_v44, 0.0  ;;  %v1740_v2 = vadd.f32 %v1732_v45, %v1610_v58  ;;  %v1871_v20 = vadd.f32 %v1863_v53, %v1741_v15  ;;  %v3976_v15 = vmax.f32 %v3477_v8, 0.0 }
 0x12f   :  { %v1703_v61 = vpop.f32.mrf.mxu0  ;;  %v1865_v16 = vmax.f32 %v3656_v35, 0.0 }
 0x130   :  { %v3664_v3 = vpop.f32.mrf.mxu1  ;;  %v1734_v52 = vmax.f32 %v1703_v61, 0.0  ;;  %v1743_v44 = vadd.f32 %v1735_v32, %v1613_v24  ;;  %v1870_v9 = vadd.f32 %v1862_v63, %v1740_v2  ;;  %v3978_v63 = vmax.f32 %v3485_v55, 0.0 }
 0x131   :  { %v2879_v31 = vpop.f32.mrf.mxu0  ;;  %v1864_v57 = vmax.f32 %v3664_v3, 0.0 }
 0x132   :  { %v3669_v37 = vpop.f32.mrf.mxu1  ;;  %v1737_v36 = vmax.f32 %v2879_v31, 0.0  ;;  %v1742_v41 = vadd.f32 %v1734_v52, %v1612_v59  ;;  %v1873_v31 = vadd.f32 %v1865_v16, %v1743_v44 }
 0x133   :  { %v1713_v0 = vpop.f32.mrf.mxu0  ;;  %v1867_v34 = vmax.f32 %v3669_v37, 0.0 }
 0x134   :  { %v3675_v23 = vpop.f32.mrf.mxu1  ;;  %v1736_v51 = vmax.f32 %v1713_v0, 0.0  ;;  %v1745_v42 = vadd.f32 %v1737_v36, %v1615_v5  ;;  %v1872_v3 = vadd.f32 %v1864_v57, %v1742_v41 }
 0x135   :  { %v2882_v33 = vpop.f32.mrf.mxu0  ;;  %v1866_v26 = vmax.f32 %v3675_v23, 0.0 }
 0x136   :  { %v3681_v22 = vpop.f32.mrf.mxu1  ;;  %v1739_v17 = vmax.f32 %v2882_v33, 0.0  ;;  %v1744_v0 = vadd.f32 %v1736_v51, %v1614_v6  ;;  %v1875_v32 = vadd.f32 %v1867_v34, %v1745_v42  ;;  %v3977_v6 = vmax.f32 %v3480_v39, 0.0 }
 0x137   :  { %v1723_v38 = vpop.f32.mrf.mxu0  ;;  %v1869_v50 = vmax.f32 %v3681_v22, 0.0 }
 0x138   :  { %v3683_v47 = vpop.f32.mrf.mxu1  ;;  %v1738_v37 = vmax.f32 %v1723_v38, 0.0  ;;  %v1747_v33 = vadd.f32 %v1739_v17, %v1617_v4  ;;  %v1874_v59 = vadd.f32 %v1866_v26, %v1744_v0  ;;  %v3980_v17 = vmax.f32 %v3495_v1, 0.0  ;;  %v3984_v1 = vld [vmem:[#allocation5_spill] sm:$0xff] }
 0x139   :  { %v2901_v30 = vpop.f32.mrf.mxu0  ;;  %v1868_v4 = vmax.f32 %v3683_v47, 0.0  ;;  %v3981_v0 = vmax.f32 %v3500_v7, 0.0 }
 0x13a   :  { %v1993_v21 = vmax.f32 %v2901_v30, 0.0  ;;  %v3688_v61 = vpop.f32.mrf.mxu1  ;;  %v1746_v2 = vadd.f32 %v1738_v37, %v1616_v54  ;;  %v1877_v30 = vadd.f32 %v1869_v50, %v1747_v33 }
 0x13b   :  { %v2123_v29 = vmax.f32 %v3688_v61, 0.0  ;;  %v1953_v40 = vpop.f32.mrf.mxu0  ;;  %v3003_v61 = vmov 1.0  }
 0x13c   :  { %v2001_v62 = vadd.f32 %v1993_v21, %v1871_v20  ;;  %v1992_v35 = vmax.f32 %v1953_v40, 0.0  ;;  %v3692_v56 = vpop.f32.mrf.mxu1 }
 0x13d   :  { %v2904_v48 = vpop.f32.mrf.mxu0  ;;  %v2122_v13 = vmax.f32 %v3692_v56, 0.0  ;;  %v2170_v56 = vld [vmem:[%s3962_s2 + $0x80] sm:$0xff] }
 0x13e   :  { %v3697_v28 = vadd.f32 %v2123_v29, %v2001_v62  ;;  %v2000_v46 = vadd.f32 %v1992_v35, %v1870_v9  ;;  %v1995_v19 = vmax.f32 %v2904_v48, 0.0  ;;  %v3700_v11 = vpop.f32.mrf.mxu1  ;;  %v3979_v62 = vmax.f32 %v3490_v60, 0.0 }
 0x13f   :  { %v2125_v12 = vmax.f32 %v3700_v11, 0.0  ;;  %v1963_v49 = vpop.f32.mrf.mxu0  ;;  %v1876_v35 = vadd.f32 %v1868_v4, %v1746_v2  ;;  %v2178_v2 = vld [vmem:[%s3962_s2 + $0xc0] sm:$0xff]  ;;  %v2183_v4 = vld [vmem:[%s3962_s2 + $0xe8] sm:$0xff] }
 0x140   :  { %v3706_v45 = vadd.f32 %v2122_v13, %v2000_v46  ;;  %v2003_v58 = vadd.f32 %v1995_v19, %v1873_v31  ;;  %v1994_v10 = vmax.f32 %v1963_v49, 0.0  ;;  %v3708_v27 = vpop.f32.mrf.mxu1  ;;  %v3714_v23 = vsub.f32 %v3697_v28, %v3976_v15 }
 0x141   :  { %v2907_v18 = vpop.f32.mrf.mxu0  ;;  %v2124_v25 = vmax.f32 %v3708_v27, 0.0  ;;  %v3982_v49 = vmax.f32 %v3505_v14, 0.0  ;;  %v2139_v11 = vsub.f32 %v3697_v28, %v2123_v29  ;;  %v2154_v29 = vld [vmem:[%s3962_s2] sm:$0xff]  ;;  %v2172_v27 = vld [vmem:[%s3962_s2 + $0x90] sm:$0xff] }
 0x142   :  { %v3718_v53 = vadd.f32 %v2125_v12, %v2003_v58  ;;  %v2002_v24 = vadd.f32 %v1994_v10, %v1872_v3  ;;  %v1997_v52 = vmax.f32 %v2907_v18, 0.0  ;;  %v3721_v38 = vpop.f32.mrf.mxu1  ;;  %v3727_v8 = vsub.f32 %v3706_v45, %v3977_v6  ;;  %v2179_v6 = vld [vmem:[%s3962_s2 + $0xc8] sm:$0xff] }
 0x143   :  { %v2127_v5 = vmax.f32 %v3721_v38, 0.0  ;;  %v1973_v22 = vpop.f32.mrf.mxu0  ;;  %v3983_v58 = vmov 0.0   ;;  %v3985_v10 = vmax.f32 %v3984_v1, 0.0  ;;  %v2177_v38 = vld [vmem:[%s3962_s2 + $0xb8] sm:$0xff] }
 0x144   :  { %v3731_v43 = vadd.f32 %v2124_v25, %v2002_v24  ;;  %v2005_v44 = vadd.f32 %v1997_v52, %v1875_v32  ;;  %v1996_v16 = vmax.f32 %v1973_v22, 0.0  ;;  %v3733_v36 = vpop.f32.mrf.mxu1  ;;  %v3739_v39 = vsub.f32 %v3718_v53, %v3978_v63  ;;  %v2158_v24 = vld [vmem:[%s3962_s2 + $0x20] sm:$0xff]  ;;  %v2161_v52 = vld [vmem:[%s3962_s2 + $0x38] sm:$0xff]  ;;  %v2163_v22 = vld [vmem:[%s3962_s2 + $0x48] sm:$0xff] }
 0x145   :  { %v2910_v20 = vpop.f32.mrf.mxu0  ;;  %v2126_v41 = vmax.f32 %v3733_v36, 0.0  ;;  %v2141_v18 = vsub.f32 %v3718_v53, %v2125_v12  ;;  %v2138_v12 = vsub.f32 %v3706_v45, %v2122_v13  ;;  %v2173_v13 = vld [vmem:[%s3962_s2 + $0x98] sm:$0xff]  ;;  %v2180_v36 = vld [vmem:[%s3962_s2 + $0xd0] sm:$0xff]  ;;  %v2182_v63 = vld [vmem:[%s3962_s2 + $0xe0] sm:$0xff] }
 0x146   :  { %v2135_v21 = vadd.f32 %v2127_v5, %v2005_v44  ;;  %v2004_v54 = vadd.f32 %v1996_v16, %v1874_v59  ;;  %v1999_v51 = vmax.f32 %v2910_v20, 0.0  ;;  %v2924_v40 = vpop.f32.mrf.mxu1  ;;  %v3747_v47 = vsub.f32 %v3731_v43, %v3979_v62  ;;  %v2160_v59 = vld [vmem:[%s3962_s2 + $0x30] sm:$0xff]  ;;  %v2181_v44 = vld [vmem:[%s3962_s2 + $0xd8] sm:$0xff]  ;;  %v2166_v20 = vld [vmem:[%s3962_s2 + $0x60] sm:$0xff] }
 0x147   :  { %v2129_v9 = vmax.f32 %v2924_v40, 0.0  ;;  %v1983_v57 = vpop.f32.mrf.mxu0  ;;  %v2140_v15 = vsub.f32 %v3731_v43, %v2124_v25  ;;  %v2174_v25 = vld [vmem:[%s3962_s2 + $0xa0] sm:$0xff]  ;;  %v2164_v16 = vld [vmem:[%s3962_s2 + $0x50] sm:$0xff] }
 0x148   :  { %v2134_v55 = vadd.f32 %v2126_v41, %v2004_v54  ;;  %v2007_v31 = vadd.f32 %v1999_v51, %v1877_v30  ;;  %v1998_v42 = vmax.f32 %v1983_v57, 0.0  ;;  %v2113_v34 = vpop.f32.mrf.mxu1  ;;  %v3751_v48 = vsub.f32 %v2135_v21, %v3980_v17  ;;  %v2167_v30 = vld [vmem:[%s3962_s2 + $0x68] sm:$0xff]  ;;  %v2168_v54 = vld [vmem:[%s3962_s2 + $0x70] sm:$0xff] }
 0x149   :  { %v2128_v3 = vmax.f32 %v2113_v34, 0.0  ;;  %v2143_v33 = vsub.f32 %v2135_v21, %v2127_v5  ;;  %v2176_v5 = vld [vmem:[%s3962_s2 + $0xb0] sm:$0xff] }
 0x14a   :  { %v2137_v46 = vadd.f32 %v2129_v9, %v2007_v31  ;;  %v2006_v19 = vadd.f32 %v1998_v42, %v1876_v35  ;;  %v3755_v26 = vsub.f32 %v2134_v55, %v3981_v0  ;;  %v2142_v50 = vsub.f32 %v2134_v55, %v2126_v41  ;;  %v2184_v41 = vld [vmem:[%s3962_s2 + $0xf0] sm:$0xff] }
 0x14c   :  { %v2136_v60 = vadd.f32 %v2128_v3, %v2006_v19  ;;  %2236 = vmatpush1.msra.mxu0 %v2137_v46  ;;  %2950 = vmatpush1.msra.mxu1 %v2137_v46  ;;  %v3759_v37 = vsub.f32 %v2137_v46, %v3982_v49  ;;  %v2145_v7 = vsub.f32 %v2137_v46, %v2129_v9 }
 0x14d   :  { %2237 = vmatprep.subr.mxu0 %v3983_v58  ;;  %2926 = vmatprep.subr.mxu1 %v3983_v58 }
 0x14e   :  { %2238 = vmatpush1.msra.mxu0 %v2136_v60  ;;  %2951 = vmatpush1.msra.mxu1 %v2136_v60  ;;  %v3765_v32 = vsub.f32 %v2136_v60, %v3985_v10  ;;  %v2144_v14 = vsub.f32 %v2136_v60, %v2128_v3 }
 0x14f   :  { %2239 = vmatprep.subr.mxu0 %v3983_v58  ;;  %2927 = vmatprep.subr.mxu1 %v3983_v58 }
 0x150   :  { %2240 = vmatpush1.msra.mxu0 %v2135_v21  ;;  %2952 = vmatpush1.msra.mxu1 %v2135_v21  ;;  %v2185_v21 = vld [vmem:[%s3962_s2 + $0xf8] sm:$0xff] }
 0x151   :  { %2241 = vmatprep.subr.mxu0 %v3983_v58  ;;  %2928 = vmatprep.subr.mxu1 %v3983_v58 }
 0x152   :  { %2242 = vmatpush1.msra.mxu0 %v2134_v55  ;;  %2953 = vmatpush1.msra.mxu1 %v2134_v55 }
 0x153   :  { %2243 = vmatprep.subr.mxu0 %v3983_v58  ;;  %2929 = vmatprep.subr.mxu1 %v3983_v58 }
 0x154   :  { %2244 = vmatpush1.msra.mxu0 %v3718_v53  ;;  %2954 = vmatpush1.msra.mxu1 %v3718_v53  ;;  %v2175_v53 = vld [vmem:[%s3962_s2 + $0xa8] sm:$0xff] }
 0x155   :  { %2245 = vmatprep.subr.mxu0 %v3983_v58  ;;  %2930 = vmatprep.subr.mxu1 %v3983_v58 }
 0x156   :  { %2246 = vmatpush1.msra.mxu0 %v3731_v43  ;;  %2955 = vmatpush1.msra.mxu1 %v3731_v43  ;;  %v2165_v43 = vld [vmem:[%s3962_s2 + $0x58] sm:$0xff] }
 0x157   :  { %2247 = vmatprep.subr.mxu0 %v3983_v58  ;;  %2931 = vmatprep.subr.mxu1 %v3983_v58 }
 0x158   :  { %2248 = vmatpush1.msra.mxu0 %v3697_v28  ;;  %2956 = vmatpush1.msra.mxu1 %v3697_v28  ;;  %v2157_v28 = vld [vmem:[%s3962_s2 + $0x18] sm:$0xff] }
 0x159   :  { %2249 = vmatprep.subr.mxu0 %v3983_v58  ;;  %2932 = vmatprep.subr.mxu1 %v3983_v58 }
 0x15a   :  { %2250 = vmatpush1.msra.mxu0 %v3706_v45  ;;  %2957 = vmatpush1.msra.mxu1 %v3706_v45  ;;  %v2156_v45 = vld [vmem:[%s3962_s2 + $0x10] sm:$0xff] }
 0x15b   :  { %2251 = vmatprep.subr.mxu0 %v3983_v58  ;;  %2933 = vmatprep.subr.mxu1 %v3983_v58 }
 0x15c   :  { %2252 = vmatpush1.msra.mxu0 %v2145_v7  ;;  %2958 = vmatpush1.msra.mxu1 %v2145_v7 }
 0x15d   :  { %2253 = vmatprep.subr.mxu0 %v3983_v58  ;;  %2934 = vmatprep.subr.mxu1 %v3983_v58 }
 0x15e   :  { %2254 = vmatpush1.msra.mxu0 %v2144_v14  ;;  %2959 = vmatpush1.msra.mxu1 %v2144_v14 }
 0x15f   :  { %2255 = vmatprep.subr.mxu0 %v3983_v58  ;;  %2935 = vmatprep.subr.mxu1 %v3983_v58 }
 0x160   :  { %2256 = vmatpush1.msra.mxu0 %v2143_v33  ;;  %2960 = vmatpush1.msra.mxu1 %v2143_v33 }
 0x161   :  { %2257 = vmatprep.subr.mxu0 %v3983_v58  ;;  %2936 = vmatprep.subr.mxu1 %v3983_v58 }
 0x162   :  { %2258 = vmatpush1.msra.mxu0 %v2142_v50  ;;  %2961 = vmatpush1.msra.mxu1 %v2142_v50 }
 0x163   :  { %2259 = vmatprep.subr.mxu0 %v3983_v58  ;;  %2937 = vmatprep.subr.mxu1 %v3983_v58 }
 0x164   :  { %2260 = vmatpush1.msra.mxu0 %v2141_v18  ;;  %2962 = vmatpush1.msra.mxu1 %v2141_v18 }
 0x165   :  { %2261 = vmatprep.subr.mxu0 %v3983_v58  ;;  %2938 = vmatprep.subr.mxu1 %v3983_v58 }
 0x166   :  { %2262 = vmatpush1.msra.mxu0 %v2140_v15  ;;  %2963 = vmatpush1.msra.mxu1 %v2140_v15 }
 0x167   :  { %2263 = vmatprep.subr.mxu0 %v3983_v58  ;;  %2939 = vmatprep.subr.mxu1 %v3983_v58 }
 0x168   :  { %2264 = vmatpush1.msra.mxu0 %v2139_v11  ;;  %2964 = vmatpush1.msra.mxu1 %v2139_v11 }
 0x169   :  { %2265 = vmatprep.subr.mxu0 %v3983_v58  ;;  %2940 = vmatprep.subr.mxu1 %v3983_v58 }
 0x16a   :  { %2266 = vmatpush1.msra.mxu0 %v2138_v12  ;;  %2965 = vmatpush1.msra.mxu1 %v2138_v12 }
 0x16b   :  { %2281 = vmatprep.subr.mxu0 %v3983_v58  ;;  %2941 = vmatprep.subr.mxu1 %v3983_v58 }
 0x16c   :  { %2540 = vmatpush2.msk.msra.mxu0 %vm23_vm0, %v3003_v61  ;;  %2966 = vmatpush2.msk.msra.mxu1 %vm23_vm0, %v3003_v61 }
 0x16d   :  { %2283 = vmatprep.subr.mxu0 %v3983_v58  ;;  %2942 = vmatprep.subr.mxu1 %v3983_v58 }
 0x16e   :  { %2284 = vmatpush2.msra.mxu0 %v3759_v37  ;;  %2967 = vmatpush2.msra.mxu1 %v3759_v37 }
 0x16f   :  { %2285 = vmatprep.subr.mxu0 %v3983_v58  ;;  %2943 = vmatprep.subr.mxu1 %v3983_v58 }
 0x170   :  { %2286 = vmatpush2.msra.mxu0 %v3765_v32  ;;  %2968 = vmatpush2.msra.mxu1 %v3765_v32 }
 0x171   :  { %2287 = vmatprep.subr.mxu0 %v3983_v58  ;;  %2944 = vmatprep.subr.mxu1 %v3983_v58 }
 0x172   :  { %2288 = vmatpush2.msra.mxu0 %v3751_v48  ;;  %2969 = vmatpush2.msra.mxu1 %v3751_v48 }
 0x173   :  { %2289 = vmatprep.subr.mxu0 %v3983_v58  ;;  %2945 = vmatprep.subr.mxu1 %v3983_v58 }
 0x174   :  { %2290 = vmatpush2.msra.mxu0 %v3755_v26  ;;  %2970 = vmatpush2.msra.mxu1 %v3755_v26 }
 0x175   :  { %2291 = vmatprep.subr.mxu0 %v3983_v58  ;;  %2946 = vmatprep.subr.mxu1 %v3983_v58 }
 0x176   :  { %2292 = vmatpush2.msra.mxu0 %v3739_v39  ;;  %2971 = vmatpush2.msra.mxu1 %v3739_v39  ;;  %v2169_v39 = vld [vmem:[%s3962_s2 + $0x78] sm:$0xff] }
 0x177   :  { %2293 = vmatprep.subr.mxu0 %v3983_v58  ;;  %2947 = vmatprep.subr.mxu1 %v3983_v58 }
 0x178   :  { %2294 = vmatpush2.msra.mxu0 %v3747_v47  ;;  %2972 = vmatpush2.msra.mxu1 %v3747_v47 }
 0x179   :  { %2295 = vmatprep.subr.mxu0 %v3983_v58  ;;  %2948 = vmatprep.subr.mxu1 %v3983_v58 }
 0x17a   :  { %2296 = vmatpush2.msra.mxu0 %v3714_v23  ;;  %2973 = vmatpush2.msra.mxu1 %v3714_v23  ;;  %v2159_v23 = vld [vmem:[%s3962_s2 + $0x28] sm:$0xff] }
 0x17b   :  { %2297 = vmatprep.subr.mxu0 %v3983_v58  ;;  %2949 = vmatprep.subr.mxu1 %v3983_v58 }
 0x17c   :  { %2298 = vmatpush2.msra.mxu0 %v3727_v8  ;;  %2974 = vmatpush2.msra.mxu1 %v3727_v8  ;;  %v2162_v8 = vld [vmem:[%s3962_s2 + $0x40] sm:$0xff]  ;;  %s3004_s2 = smov [#allocation2]  }
 0x17d   :  { %2300 = vmatmul.mubr.f32.vlgmr.msra.gmra.mxu0 %v2154_v29  ;;  %2340 = vmatmul.mubr.f32.vlgmr.msra.gmra.mxu1 %v2170_v56  ;;  %s2401_s10 = sshll.u32 %s3004_s2, 4  ;;  %s2402_s10 = int_to_ptr.vmem [resolvable:$true] %s2401_s10 }
 0x17e   :  { %2542 = vmatprep.mubr.msk.f32.mxu0 %vm2186_vm4, %v2157_v28  ;;  %2550 = vmatprep.mubr.msk.f32.mxu1 %vm2186_vm4, %v2173_v13  ;;  %s2980_s11 = scalar_lea.vmem %s2402_s10, 2048  ;;  %p2985_p1 = scmp.lt.s32.totalorder %s2402_s10, %s2402_s10 }
 0x17f   :  { %p2981_p0 = scmp.ne.s32.totalorder %s2402_s10, %s2980_s11  ;;  %p2986_p2 = scmp.lt.s32.totalorder %s2980_s11, %s2980_s11 }
 0x181   :  { %2305 = vmatmul.mubr.f32.gmra.mxu0 %v2156_v45  ;;  %2345 = vmatmul.mubr.f32.gmra.mxu1 %v2172_v27  ;;  %p2987_p3 = por %p2986_p2, %p2985_p1 }
 0x182   :  { %2543 = vmatprep.mubr.msk.f32.mxu0 %vm2186_vm4, %v2159_v23  ;;  %2551 = vmatprep.mubr.msk.f32.mxu1 %vm2186_vm4, %v2175_v53 }
 0x183   :  { %p2988_p4 = pnand %p2987_p3, %p2981_p0 }
 0x185   :  { %2310 = vmatmul.mubr.f32.gmra.mxu0 %v2158_v24  ;;  %2350 = vmatmul.mubr.f32.gmra.mxu1 %v2174_v25 }
 0x186   :  { %2544 = vmatprep.mubr.msk.f32.mxu0 %vm2186_vm4, %v2161_v52  ;;  %2552 = vmatprep.mubr.msk.f32.mxu1 %vm2186_vm4, %v2177_v38 }
 0x189   :  { %2315 = vmatmul.mubr.f32.gmra.mxu0 %v2160_v59  ;;  %2355 = vmatmul.mubr.f32.gmra.mxu1 %v2176_v5 }
 0x18a   :  { %2545 = vmatprep.mubr.msk.f32.mxu0 %vm2186_vm4, %v2163_v22  ;;  %2553 = vmatprep.mubr.msk.f32.mxu1 %vm2186_vm4, %v2179_v6 }
 0x18d   :  { %2320 = vmatmul.mubr.f32.gmra.mxu0 %v2162_v8  ;;  %2360 = vmatmul.mubr.f32.gmra.mxu1 %v2178_v2 }
 0x18e   :  { %2546 = vmatprep.mubr.msk.f32.mxu0 %vm2186_vm4, %v2165_v43  ;;  %2554 = vmatprep.mubr.msk.f32.mxu1 %vm2186_vm4, %v2181_v44 }
 0x191   :  { %2325 = vmatmul.mubr.f32.gmra.mxu0 %v2164_v16  ;;  %2365 = vmatmul.mubr.f32.gmra.mxu1 %v2180_v36 }
 0x192   :  { %2547 = vmatprep.mubr.msk.f32.mxu0 %vm2186_vm4, %v2167_v30  ;;  %2555 = vmatprep.mubr.msk.f32.mxu1 %vm2186_vm4, %v2183_v4 }
 0x195   :  { %2330 = vmatmul.mubr.f32.gmra.mxu0 %v2166_v20  ;;  %2370 = vmatmul.mubr.f32.gmra.mxu1 %v2182_v63 }
 0x196   :  { %2548 = vmatprep.mubr.msk.f32.mxu0 %vm2186_vm4, %v2169_v39  ;;  %2556 = vmatprep.mubr.msk.f32.mxu1 %vm2186_vm4, %v2185_v21 }
 0x199   :  { %2335 = vmatmul.mubr.f32.gmra.mxu0 %v2168_v54  ;;  %2375 = vmatmul.mubr.f32.gmra.mxu1 %v2184_v41 }
 0x23d   :  { %v2301_v51 = vpop.f32.mrf.mxu0  ;;  %v2341_v40 = vpop.f32.mrf.mxu1 }
 0x23e   :  { %2380 = vst [vmem:[#allocation2] sm:$0xff] %v2301_v51  ;;  %2388 = vst [vmem:[#allocation2 + $0x40] sm:$0xff] %v2341_v40 }
 0x23f   :  { %v2303_v9 = vpop.f32.mrf.mxu0  ;;  %v2343_v57 = vpop.f32.mrf.mxu1 }
 0x241   :  { %v2306_v62 = vpop.f32.mrf.mxu0  ;;  %v2346_v47 = vpop.f32.mrf.mxu1 }
 0x242   :  { %2381 = vst [vmem:[#allocation2 + $0x8] sm:$0xff] %v2306_v62  ;;  %2389 = vst [vmem:[#allocation2 + $0x48] sm:$0xff] %v2346_v47 }
 0x243   :  { %v2308_v35 = vpop.f32.mrf.mxu0  ;;  %v2348_v55 = vpop.f32.mrf.mxu1 }
 0x245   :  { %v2311_v31 = vpop.f32.mrf.mxu0  ;;  %v2351_v42 = vpop.f32.mrf.mxu1 }
 0x246   :  { %2382 = vst [vmem:[#allocation2 + $0x10] sm:$0xff] %v2311_v31  ;;  %2390 = vst [vmem:[#allocation2 + $0x50] sm:$0xff] %v2351_v42 }
 0x247   :  { %v2313_v34 = vpop.f32.mrf.mxu0  ;;  %v2353_v17 = vpop.f32.mrf.mxu1 }
 0x249   :  { %v2316_v48 = vpop.f32.mrf.mxu0  ;;  %v2356_v46 = vpop.f32.mrf.mxu1 }
 0x24a   :  { %2383 = vst [vmem:[#allocation2 + $0x18] sm:$0xff] %v2316_v48  ;;  %2391 = vst [vmem:[#allocation2 + $0x58] sm:$0xff] %v2356_v46 }
 0x24b   :  { %v2318_v19 = vpop.f32.mrf.mxu0  ;;  %v2358_v3 = vpop.f32.mrf.mxu1 }
 0x24d   :  { %v2321_v0 = vpop.f32.mrf.mxu0  ;;  %v2361_v26 = vpop.f32.mrf.mxu1 }
 0x24e   :  { %2384 = vst [vmem:[#allocation2 + $0x20] sm:$0xff] %v2321_v0  ;;  %2392 = vst [vmem:[#allocation2 + $0x60] sm:$0xff] %v2361_v26 }
 0x24f   :  { %v2323_v60 = vpop.f32.mrf.mxu0  ;;  %v2363_v49 = vpop.f32.mrf.mxu1 }
 0x251   :  { %v2326_v37 = vpop.f32.mrf.mxu0  ;;  %v2366_v58 = vpop.f32.mrf.mxu1 }
 0x252   :  { %2385 = vst [vmem:[#allocation2 + $0x28] sm:$0xff] %v2326_v37  ;;  %2393 = vst [vmem:[#allocation2 + $0x68] sm:$0xff] %v2366_v58 }
 0x253   :  { %v2328_v1 = vpop.f32.mrf.mxu0  ;;  %v2368_v10 = vpop.f32.mrf.mxu1 }
 0x255   :  { %v2331_v32 = vpop.f32.mrf.mxu0  ;;  %v2371_v7 = vpop.f32.mrf.mxu1 }
 0x256   :  { %2386 = vst [vmem:[#allocation2 + $0x30] sm:$0xff] %v2331_v32  ;;  %2394 = vst [vmem:[#allocation2 + $0x70] sm:$0xff] %v2371_v7 }
 0x257   :  { %v2333_v14 = vpop.f32.mrf.mxu0  ;;  %v2373_v33 = vpop.f32.mrf.mxu1 }
 0x259   :  { %v2336_v50 = vpop.f32.mrf.mxu0  ;;  %v2376_v18 = vpop.f32.mrf.mxu1 }
 0x25a   :  { %2387 = vst [vmem:[#allocation2 + $0x38] sm:$0xff] %v2336_v50  ;;  %2395 = vst [vmem:[#allocation2 + $0x78] sm:$0xff] %v2376_v18 }
 0x25b   :  { %v2338_v15 = vpop.f32.mrf.mxu0  ;;  %v2378_v11 = vpop.f32.mrf.mxu1 }
 0x25c   :  { %2991 = shalt.err (!%p2988_p4)
}
 0x25d   :  { %s3005_s12 = smov 128   ;;  %s3006_s13 = smov 8  }
 0x25e   :  { %2407 = dma.vmem_to_hbm [thread:$0]  %s2402_s10, 2048, %s3963_s3, [#allocation3], %s3005_s12, %s3005_s12, %s3006_s13  }
 0x25f   :  { %3000 = dma.done.wait [#allocation3], 2048  }
 0x260   :  { %3001 = vsyncadd [#allocation3], 4294965248 }
 0x261   :  { %2411 = vsyncpa [#allocation3], 1 }

</bundles_post_ra>
